<compile_context>
chip_gen: v7x
topology: tpu7x:2x2x1
jax: 0.10.0
libtpu: 0.0.40
codegen_flags: <defaults>
</compile_context>

<pallas_src>
import functools

import jax
import jax.numpy as jnp
from jax.experimental import pallas as pl
from jax.experimental.pallas import tpu as pltpu


# ----------------------------------------------------------------------------
# Kernel 1: fused transformer branch (per batch sample)
# ----------------------------------------------------------------------------
def _branch1_kernel(n_ref,                       # scalar-prefetch: [B] int32 (SMEM)
                    x1_ref, cls1_ref,            # [1,S1,f1_in], [1,1,f1_in]
                    tw_ref, tb_ref,              # [f1_in,d], [1,d]
                    wqkv_ref, bqkv_ref,          # [d,3d], [1,3d]
                    wo_ref, bo_ref,              # [d,d], [1,d]
                    brw_ref, brb_ref,            # [d+f1_in,f1_out], [1,f1_out]
                    o_ref,                       # [1,1,f1_out]
                    *, H, Dh, d, S1):
    f32 = jnp.float32
    b = pl.program_id(0)

    x = x1_ref[0]                                                  # (S1, f1_in)
    # trans linear + relu
    h = jnp.dot(x, tw_ref[...], preferred_element_type=f32) + tb_ref[...]
    h = jnp.maximum(h, 0.0)                                        # (S1, d)

    # fused QKV projection: one (S1,d) x (d,3d) matmul
    qkv = jnp.dot(h, wqkv_ref[...], preferred_element_type=f32) + bqkv_ref[...]

    scale = 1.0 / (Dh ** 0.5)
    heads = []
    for hh in range(H):                                            # static loop
        qh = qkv[:, hh * Dh:(hh + 1) * Dh]                         # (S1, Dh)
        kh = qkv[:, d + hh * Dh: d + (hh + 1) * Dh]
        vh = qkv[:, 2 * d + hh * Dh: 2 * d + (hh + 1) * Dh]
        # q·kᵀ via dot_general contracting the Dh axes (no explicit transpose)
        s = jax.lax.dot_general(qh, kh, (((1,), (1,)), ((), ())),
                                preferred_element_type=f32) * scale
        m = jnp.max(s, axis=-1, keepdims=True)
        p = jnp.exp(s - m)
        denom = jnp.sum(p, axis=-1, keepdims=True)
        oh = jnp.dot(p, vh, preferred_element_type=f32)            # (S1, Dh)
        heads.append(oh * pl.reciprocal(denom, approx=True))
    attn = jnp.concatenate(heads, axis=-1)                         # (S1, d) lane-dense

    # output projection
    h1 = jnp.dot(attn, wo_ref[...], preferred_element_type=f32) + bo_ref[...]

    # masked mean pool over valid tokens (n_node_1, via scalar prefetch)
    n = n_ref[b]
    row = jax.lax.broadcasted_iota(jnp.int32, (S1, 1), 0)
    mask = (row < n).astype(f32)                                   # (S1, 1)
    cnt = jnp.maximum(jnp.sum(mask), 1.0)
    pooled = jnp.sum(h1 * mask, axis=0, keepdims=True) * (1.0 / cnt)   # (1, d)

    # br1: [pooled1, cls1] @ br1_w + b  as two matmuls (no lane concat), relu
    brw = brw_ref[...]
    cls = cls1_ref[0]                                              # (1, f1_in)
    z = (jnp.dot(pooled, brw[:d, :], preferred_element_type=f32)
         + jnp.dot(cls, brw[d:, :], preferred_element_type=f32)
         + brb_ref[...])
    o_ref[0] = jnp.maximum(z, 0.0)


# ----------------------------------------------------------------------------
# Kernel 2: fused GCN branch + per-graph pooling + br2 + ft_com fusion head
# ----------------------------------------------------------------------------
def _branch2_fusion_kernel(x2_ref, ah_ref, p_ref, cls2_ref, out1_ref,
                           g1w_ref, g1b_ref, g2w_ref, g2b_ref,
                           brw_ref, brb_ref,
                           c1w_ref, c1b_ref, c2w_ref, c2b_ref,
                           o_ref, *, g2_dim, f1_out):
    f32 = jnp.float32
    ah = ah_ref[...]                                               # (N2, N2)

    # GCN layer 1: relu(A_hat (X W1 + b1))
    g = jnp.dot(x2_ref[...], g1w_ref[...], preferred_element_type=f32) + g1b_ref[...]
    g = jnp.maximum(jnp.dot(ah, g, preferred_element_type=f32), 0.0)
    # GCN layer 2: relu(A_hat (H W2 + b2))
    g = jnp.dot(g, g2w_ref[...], preferred_element_type=f32) + g2b_ref[...]
    g = jnp.maximum(jnp.dot(ah, g, preferred_element_type=f32), 0.0)

    # per-graph mean pooling via normalized one-hot matmul
    pooled2 = jnp.dot(p_ref[...], g, preferred_element_type=f32)   # (B, g2)

    # br2: [pooled2, cls2] @ br2_w + b, relu (split weight -> no lane concat)
    brw = brw_ref[...]
    z2 = (jnp.dot(pooled2, brw[:g2_dim, :], preferred_element_type=f32)
          + jnp.dot(cls2_ref[...], brw[g2_dim:, :], preferred_element_type=f32)
          + brb_ref[...])
    z2 = jnp.maximum(z2, 0.0)                                      # (B, f2_out)

    # fusion head (ft_com): relu([out1, out2] @ W1 + b1) @ W2 + b2
    out1 = out1_ref[...][:, 0, :]                                  # (B, f1_out)
    c1w = c1w_ref[...]
    zc = (jnp.dot(out1, c1w[:f1_out, :], preferred_element_type=f32)
          + jnp.dot(z2, c1w[f1_out:, :], preferred_element_type=f32)
          + c1b_ref[...])
    zc = jnp.maximum(zc, 0.0)
    o_ref[...] = jnp.dot(zc, c2w_ref[...], preferred_element_type=f32) + c2b_ref[...]


# ----------------------------------------------------------------------------
# Parameters (deterministic init, synthetic)
# ----------------------------------------------------------------------------
def init_params(key, cfg):
    def dense(key, fan_in, fan_out):
        kw, kb = jax.random.split(key)
        scale = 1.0 / jnp.sqrt(jnp.float32(fan_in))
        w = jax.random.normal(kw, (fan_in, fan_out), jnp.float32) * scale
        b = jax.random.normal(kb, (fan_out,), jnp.float32) * 0.01
        return w, b

    d = cfg["ft_trans"][0]
    g1, g2 = cfg["ft_gcn"]
    c1, c2 = cfg["ft_com"]
    keys = jax.random.split(key, 12)
    p = {}
    p["trans_w"], p["trans_b"] = dense(keys[0], cfg["f1_in"], d)
    p["wqkv"], p["bqkv"] = dense(keys[1], d, 3 * d)     # fused Q/K/V projection
    p["wo"], p["bo"] = dense(keys[4], d, d)
    p["gcn1_w"], p["gcn1_b"] = dense(keys[5], cfg["f2_in"], g1)
    p["gcn2_w"], p["gcn2_b"] = dense(keys[6], g1, g2)
    p["br1_w"], p["br1_b"] = dense(keys[7], d + cfg["f1_in"], cfg["f1_out"])
    p["br2_w"], p["br2_b"] = dense(keys[8], g2 + cfg["f2_in"], cfg["f2_out"])
    p["com1_w"], p["com1_b"] = dense(keys[9], cfg["f1_out"] + cfg["f2_out"], c1)
    p["com2_w"], p["com2_b"] = dense(keys[10], c1, c2)
    return p


# ----------------------------------------------------------------------------
# MH forward — two fused pallas_calls
# ----------------------------------------------------------------------------
def mh_forward(params, data, cfg):
    x1 = data["ft_1"]                  # [B, S1, f1_in]
    x2 = data["ft_2"]                  # [N2, f2_in]
    n1 = data["n_node_1"].astype(jnp.int32)   # [B]
    edge_index = data["edge_index"]    # [2, E]
    edge_attr = data["edge_attr"]      # [E]
    batch_index = data["batch_index"]  # [N2]
    cls1 = data["ft_proj_1"]           # [B, f1_in]
    cls2 = data["ft_proj_2"]           # [B, f2_in]

    B, S1, f1_in = x1.shape
    N2, f2_in = x2.shape
    H = cfg["n_heads"]
    d = cfg["ft_trans"][0]
    Dh = d // H
    g2 = cfg["ft_gcn"][-1]
    f1_out, f2_out = cfg["f1_out"], cfg["f2_out"]
    c1, c2 = cfg["ft_com"]

    # ---- branch 1: fused transformer branch, one pallas_call, grid=(B,) ----
    out1 = pl.pallas_call(
        functools.partial(_branch1_kernel, H=H, Dh=Dh, d=d, S1=S1),
        out_shape=jax.ShapeDtypeStruct((B, 1, f1_out), jnp.float32),
        grid_spec=pltpu.PrefetchScalarGridSpec(
            num_scalar_prefetch=1,
            grid=(B,),
            in_specs=[
                pl.BlockSpec((1, S1, f1_in), lambda b, n: (b, 0, 0)),   # x1
                pl.BlockSpec((1, 1, f1_in), lambda b, n: (b, 0, 0)),    # cls1
                pl.BlockSpec((f1_in, d), lambda b, n: (0, 0)),          # trans_w
                pl.BlockSpec((1, d), lambda b, n: (0, 0)),              # trans_b
                pl.BlockSpec((d, 3 * d), lambda b, n: (0, 0)),          # wqkv
                pl.BlockSpec((1, 3 * d), lambda b, n: (0, 0)),          # bqkv
                pl.BlockSpec((d, d), lambda b, n: (0, 0)),              # wo
                pl.BlockSpec((1, d), lambda b, n: (0, 0)),              # bo
                pl.BlockSpec((d + f1_in, f1_out), lambda b, n: (0, 0)), # br1_w
                pl.BlockSpec((1, f1_out), lambda b, n: (0, 0)),         # br1_b
            ],
            out_specs=pl.BlockSpec((1, 1, f1_out), lambda b, n: (b, 0, 0)),
        ),
        compiler_params=pltpu.CompilerParams(
            dimension_semantics=("parallel",)),   # v7x: shard batch over 2 TCs
    )(
        n1,
        x1, cls1.reshape(B, 1, f1_in),
        params["trans_w"], params["trans_b"].reshape(1, d),
        params["wqkv"], params["bqkv"].reshape(1, 3 * d),
        params["wo"], params["bo"].reshape(1, d),
        params["br1_w"], params["br1_b"].reshape(1, f1_out),
    )

    # ---- branch 2 prep (tiny XLA ops: scatter-add adjacency, one-hot pool) ----
    A = jnp.zeros((N2, N2), jnp.float32)
    A = A.at[edge_index[0], edge_index[1]].add(edge_attr.astype(jnp.float32))
    A = A + A.T + jnp.eye(N2, dtype=jnp.float32)
    dinv = 1.0 / jnp.sqrt(jnp.maximum(A.sum(axis=-1), 1e-6))
    A_hat = dinv[:, None] * A * dinv[None, :]

    P = (batch_index[None, :] == jnp.arange(B)[:, None]).astype(jnp.float32)
    P = P / jnp.maximum(P.sum(axis=-1, keepdims=True), 1.0)

    # ---- branch 2 + fusion head: one fused pallas_call (whole arrays in VMEM) ----
    z = pl.pallas_call(
        functools.partial(_branch2_fusion_kernel, g2_dim=g2, f1_out=f1_out),
        out_shape=jax.ShapeDtypeStruct((B, c2), jnp.float32),
    )(
        x2, A_hat, P, cls2, out1,
        params["gcn1_w"], params["gcn1_b"].reshape(1, -1),
        params["gcn2_w"], params["gcn2_b"].reshape(1, -1),
        params["br2_w"], params["br2_b"].reshape(1, -1),
        params["com1_w"], params["com1_b"].reshape(1, -1),
        params["com2_w"], params["com2_b"].reshape(1, -1),
    )
    return z


# ----------------------------------------------------------------------------
# Driver
# ----------------------------------------------------------------------------
if __name__ == "__main__":
    cfg = dict(f1_in=128, f2_in=128, ft_trans=[128], ft_gcn=[128, 128],
               ft_com=[128, 128], f1_out=128, f2_out=128, n_heads=4)

    B, S1 = 2, 16          # batch, tokens per sample (modality 1)
    NPG = 16               # graph nodes per sample (modality 2)
    N2 = B * NPG
    E = 64                 # directed edges (will be symmetrized)

    root = jax.random.PRNGKey(0)
    kp, k1, k2, k3a, k3b, k4, k5, k6 = jax.random.split(root, 8)

    params = init_params(kp, cfg)

    # intra-graph random edges
    src0 = jax.random.randint(k5, (E // 2,), 0, NPG)
    dst0 = jax.random.randint(k6, (E // 2,), 0, NPG)
    edge_index = jnp.concatenate(
        [jnp.stack([src0, dst0]), jnp.stack([src0 + NPG, dst0 + NPG])], axis=1
    ).astype(jnp.int32)
    edge_attr = jnp.abs(jax.random.normal(k4, (E,), jnp.float32)) + 0.1

    data = {
        "ft_1": jax.random.normal(k1, (B, S1, cfg["f1_in"]), jnp.float32),
        "ft_2": jax.random.normal(k2, (N2, cfg["f2_in"]), jnp.float32),
        "n_node_1": jnp.array([16, 12], jnp.int32),
        "n_node_2": jnp.array([NPG, NPG], jnp.int32),
        "edge_index": edge_index,
        "edge_attr": edge_attr,
        "batch_index": jnp.repeat(jnp.arange(B, dtype=jnp.int32), NPG),
        "ft_proj_1": jax.random.normal(k3a, (B, cfg["f1_in"]), jnp.float32),
        "ft_proj_2": jax.random.normal(k3b, (B, cfg["f2_in"]), jnp.float32),
    }

    out = mh_forward(params, data, cfg)
    out = jax.block_until_ready(out)
    assert out.shape == (B, cfg["ft_com"][-1]) and jnp.all(jnp.isfinite(out))
    print("KERNEL_OK")
</pallas_src>

<mosaic_0001>
module attributes {stable_mosaic.version = 11 : i64} {
  func.func @_branch1_kernel(%arg0: i32, %arg1: memref<2xi32, #tpu.memory_space<smem>>, %arg2: memref<1x16x128xf32, #tpu.memory_space<vmem>>, %arg3: memref<1x1x128xf32, #tpu.memory_space<vmem>>, %arg4: memref<128x128xf32, #tpu.memory_space<vmem>>, %arg5: memref<1x128xf32, #tpu.memory_space<vmem>>, %arg6: memref<128x384xf32, #tpu.memory_space<vmem>>, %arg7: memref<1x384xf32, #tpu.memory_space<vmem>>, %arg8: memref<128x128xf32, #tpu.memory_space<vmem>>, %arg9: memref<1x128xf32, #tpu.memory_space<vmem>>, %arg10: memref<256x128xf32, #tpu.memory_space<vmem>>, %arg11: memref<1x128xf32, #tpu.memory_space<vmem>>, %arg12: memref<1x1x128xf32, #tpu.memory_space<vmem>>) attributes {dimension_semantics = [#tpu.dimension_semantics<parallel>], iteration_bounds = array<i64: 2>, scalar_prefetch = 1 : i64, scratch_operands = 0 : i64, tpu.core_type = #tpu.core_type<tc>, window_params = [{transform_indices = @transform_0, window_bounds = array<i64: 1, 16, 128>}, {transform_indices = @transform_1, window_bounds = array<i64: 1, 1, 128>}, {pipeline_mode = #tpu.pipeline_mode<synchronous>, transform_indices = @transform_2, window_bounds = array<i64: 128, 128>}, {pipeline_mode = #tpu.pipeline_mode<synchronous>, transform_indices = @transform_3, window_bounds = array<i64: 1, 128>}, {pipeline_mode = #tpu.pipeline_mode<synchronous>, transform_indices = @transform_4, window_bounds = array<i64: 128, 384>}, {pipeline_mode = #tpu.pipeline_mode<synchronous>, transform_indices = @transform_5, window_bounds = array<i64: 1, 384>}, {pipeline_mode = #tpu.pipeline_mode<synchronous>, transform_indices = @transform_6, window_bounds = array<i64: 128, 128>}, {pipeline_mode = #tpu.pipeline_mode<synchronous>, transform_indices = @transform_7, window_bounds = array<i64: 1, 128>}, {pipeline_mode = #tpu.pipeline_mode<synchronous>, transform_indices = @transform_8, window_bounds = array<i64: 256, 128>}, {pipeline_mode = #tpu.pipeline_mode<synchronous>, transform_indices = @transform_9, window_bounds = array<i64: 1, 128>}, {transform_indices = @transform_10, window_bounds = array<i64: 1, 1, 128>}]} {
    %c0 = arith.constant 0 : index
    %c0_0 = arith.constant 0 : index
    %c0_1 = arith.constant 0 : index
    %0 = vector.load %arg2[%c0, %c0_0, %c0_1] : memref<1x16x128xf32, #tpu.memory_space<vmem>>, vector<1x16x128xf32>
    %1 = vector.shape_cast %0 : vector<1x16x128xf32> to vector<16x128xf32>
    %c0_2 = arith.constant 0 : index
    %c0_3 = arith.constant 0 : index
    %2 = vector.load %arg4[%c0_2, %c0_3] : memref<128x128xf32, #tpu.memory_space<vmem>>, vector<128x128xf32>
    %cst = arith.constant dense<0.000000e+00> : vector<16x128xf32>
    %3 = tpu.matmul %1, %2, %cst {dimension_numbers = #tpu.dot_dimension_numbers<[1], [0], [0], [1], [0, 0, 1, 1], [], []>} : vector<16x128xf32>, vector<128x128xf32>, vector<16x128xf32> -> vector<16x128xf32>
    %c0_4 = arith.constant 0 : index
    %c0_5 = arith.constant 0 : index
    %4 = vector.load %arg5[%c0_4, %c0_5] : memref<1x128xf32, #tpu.memory_space<vmem>>, vector<1x128xf32>
    %5 = vector.broadcast %4 : vector<1x128xf32> to vector<16x128xf32>
    %6 = arith.addf %3, %5 : vector<16x128xf32>
    %cst_6 = arith.constant 0.000000e+00 : f32
    %7 = vector.broadcast %cst_6 : f32 to vector<16x128xf32>
    %8 = arith.maximumf %6, %7 : vector<16x128xf32>
    %c0_7 = arith.constant 0 : index
    %c0_8 = arith.constant 0 : index
    %9 = vector.load %arg6[%c0_7, %c0_8] : memref<128x384xf32, #tpu.memory_space<vmem>>, vector<128x384xf32>
    %cst_9 = arith.constant dense<0.000000e+00> : vector<16x384xf32>
    %10 = tpu.matmul %8, %9, %cst_9 {dimension_numbers = #tpu.dot_dimension_numbers<[1], [0], [0], [1], [0, 0, 1, 1], [], []>} : vector<16x128xf32>, vector<128x384xf32>, vector<16x384xf32> -> vector<16x384xf32>
    %c0_10 = arith.constant 0 : index
    %c0_11 = arith.constant 0 : index
    %11 = vector.load %arg7[%c0_10, %c0_11] : memref<1x384xf32, #tpu.memory_space<vmem>>, vector<1x384xf32>
    %12 = vector.broadcast %11 : vector<1x384xf32> to vector<16x384xf32>
    %13 = arith.addf %10, %12 : vector<16x384xf32>
    %14 = vector.extract_strided_slice %13 {offsets = [0, 0], sizes = [16, 32], strides = [1, 1]} : vector<16x384xf32> to vector<16x32xf32>
    %15 = vector.extract_strided_slice %13 {offsets = [0, 128], sizes = [16, 32], strides = [1, 1]} : vector<16x384xf32> to vector<16x32xf32>
    %16 = vector.extract_strided_slice %13 {offsets = [0, 256], sizes = [16, 32], strides = [1, 1]} : vector<16x384xf32> to vector<16x32xf32>
    %cst_12 = arith.constant dense<0.000000e+00> : vector<16x16xf32>
    %17 = tpu.matmul %14, %15, %cst_12 {dimension_numbers = #tpu.dot_dimension_numbers<[1], [1], [0], [0], [0, 0, 1, 0], [], []>} : vector<16x32xf32>, vector<16x32xf32>, vector<16x16xf32> -> vector<16x16xf32>
    %cst_13 = arith.constant 0.176776692 : f32
    %18 = vector.broadcast %cst_13 : f32 to vector<16x16xf32>
    %19 = arith.mulf %17, %18 : vector<16x16xf32>
    %cst_14 = arith.constant dense<0xFF800000> : vector<16xf32>
    %20 = vector.multi_reduction <maximumf>, %19, %cst_14 [1] : vector<16x16xf32> to vector<16xf32>
    %21 = vector.shape_cast %20 : vector<16xf32> to vector<16x1xf32>
    %22 = vector.broadcast %21 : vector<16x1xf32> to vector<16x16xf32>
    %23 = arith.subf %19, %22 : vector<16x16xf32>
    %24 = math.exp %23 : vector<16x16xf32>
    %cst_15 = arith.constant dense<0.000000e+00> : vector<16xf32>
    %25 = vector.multi_reduction <add>, %24, %cst_15 [1] : vector<16x16xf32> to vector<16xf32>
    %26 = vector.shape_cast %25 : vector<16xf32> to vector<16x1xf32>
    %cst_16 = arith.constant dense<0.000000e+00> : vector<16x32xf32>
    %27 = tpu.matmul %24, %16, %cst_16 {dimension_numbers = #tpu.dot_dimension_numbers<[1], [0], [0], [1], [0, 0, 1, 1], [], []>} : vector<16x16xf32>, vector<16x32xf32>, vector<16x32xf32> -> vector<16x32xf32>
    %28 = tpu.reciprocal %26 {approx = true} : vector<16x1xf32> -> vector<16x1xf32>
    %29 = vector.broadcast %28 : vector<16x1xf32> to vector<16x32xf32>
    %30 = arith.mulf %27, %29 : vector<16x32xf32>
    %31 = vector.extract_strided_slice %13 {offsets = [0, 32], sizes = [16, 32], strides = [1, 1]} : vector<16x384xf32> to vector<16x32xf32>
    %32 = vector.extract_strided_slice %13 {offsets = [0, 160], sizes = [16, 32], strides = [1, 1]} : vector<16x384xf32> to vector<16x32xf32>
    %33 = vector.extract_strided_slice %13 {offsets = [0, 288], sizes = [16, 32], strides = [1, 1]} : vector<16x384xf32> to vector<16x32xf32>
    %cst_17 = arith.constant dense<0.000000e+00> : vector<16x16xf32>
    %34 = tpu.matmul %31, %32, %cst_17 {dimension_numbers = #tpu.dot_dimension_numbers<[1], [1], [0], [0], [0, 0, 1, 0], [], []>} : vector<16x32xf32>, vector<16x32xf32>, vector<16x16xf32> -> vector<16x16xf32>
    %cst_18 = arith.constant 0.176776692 : f32
    %35 = vector.broadcast %cst_18 : f32 to vector<16x16xf32>
    %36 = arith.mulf %34, %35 : vector<16x16xf32>
    %cst_19 = arith.constant dense<0xFF800000> : vector<16xf32>
    %37 = vector.multi_reduction <maximumf>, %36, %cst_19 [1] : vector<16x16xf32> to vector<16xf32>
    %38 = vector.shape_cast %37 : vector<16xf32> to vector<16x1xf32>
    %39 = vector.broadcast %38 : vector<16x1xf32> to vector<16x16xf32>
    %40 = arith.subf %36, %39 : vector<16x16xf32>
    %41 = math.exp %40 : vector<16x16xf32>
    %cst_20 = arith.constant dense<0.000000e+00> : vector<16xf32>
    %42 = vector.multi_reduction <add>, %41, %cst_20 [1] : vector<16x16xf32> to vector<16xf32>
    %43 = vector.shape_cast %42 : vector<16xf32> to vector<16x1xf32>
    %cst_21 = arith.constant dense<0.000000e+00> : vector<16x32xf32>
    %44 = tpu.matmul %41, %33, %cst_21 {dimension_numbers = #tpu.dot_dimension_numbers<[1], [0], [0], [1], [0, 0, 1, 1], [], []>} : vector<16x16xf32>, vector<16x32xf32>, vector<16x32xf32> -> vector<16x32xf32>
    %45 = tpu.reciprocal %43 {approx = true} : vector<16x1xf32> -> vector<16x1xf32>
    %46 = vector.broadcast %45 : vector<16x1xf32> to vector<16x32xf32>
    %47 = arith.mulf %44, %46 : vector<16x32xf32>
    %48 = vector.extract_strided_slice %13 {offsets = [0, 64], sizes = [16, 32], strides = [1, 1]} : vector<16x384xf32> to vector<16x32xf32>
    %49 = vector.extract_strided_slice %13 {offsets = [0, 192], sizes = [16, 32], strides = [1, 1]} : vector<16x384xf32> to vector<16x32xf32>
    %50 = vector.extract_strided_slice %13 {offsets = [0, 320], sizes = [16, 32], strides = [1, 1]} : vector<16x384xf32> to vector<16x32xf32>
    %cst_22 = arith.constant dense<0.000000e+00> : vector<16x16xf32>
    %51 = tpu.matmul %48, %49, %cst_22 {dimension_numbers = #tpu.dot_dimension_numbers<[1], [1], [0], [0], [0, 0, 1, 0], [], []>} : vector<16x32xf32>, vector<16x32xf32>, vector<16x16xf32> -> vector<16x16xf32>
    %cst_23 = arith.constant 0.176776692 : f32
    %52 = vector.broadcast %cst_23 : f32 to vector<16x16xf32>
    %53 = arith.mulf %51, %52 : vector<16x16xf32>
    %cst_24 = arith.constant dense<0xFF800000> : vector<16xf32>
    %54 = vector.multi_reduction <maximumf>, %53, %cst_24 [1] : vector<16x16xf32> to vector<16xf32>
    %55 = vector.shape_cast %54 : vector<16xf32> to vector<16x1xf32>
    %56 = vector.broadcast %55 : vector<16x1xf32> to vector<16x16xf32>
    %57 = arith.subf %53, %56 : vector<16x16xf32>
    %58 = math.exp %57 : vector<16x16xf32>
    %cst_25 = arith.constant dense<0.000000e+00> : vector<16xf32>
    %59 = vector.multi_reduction <add>, %58, %cst_25 [1] : vector<16x16xf32> to vector<16xf32>
    %60 = vector.shape_cast %59 : vector<16xf32> to vector<16x1xf32>
    %cst_26 = arith.constant dense<0.000000e+00> : vector<16x32xf32>
    %61 = tpu.matmul %58, %50, %cst_26 {dimension_numbers = #tpu.dot_dimension_numbers<[1], [0], [0], [1], [0, 0, 1, 1], [], []>} : vector<16x16xf32>, vector<16x32xf32>, vector<16x32xf32> -> vector<16x32xf32>
    %62 = tpu.reciprocal %60 {approx = true} : vector<16x1xf32> -> vector<16x1xf32>
    %63 = vector.broadcast %62 : vector<16x1xf32> to vector<16x32xf32>
    %64 = arith.mulf %61, %63 : vector<16x32xf32>
    %65 = vector.extract_strided_slice %13 {offsets = [0, 96], sizes = [16, 32], strides = [1, 1]} : vector<16x384xf32> to vector<16x32xf32>
    %66 = vector.extract_strided_slice %13 {offsets = [0, 224], sizes = [16, 32], strides = [1, 1]} : vector<16x384xf32> to vector<16x32xf32>
    %67 = vector.extract_strided_slice %13 {offsets = [0, 352], sizes = [16, 32], strides = [1, 1]} : vector<16x384xf32> to vector<16x32xf32>
    %cst_27 = arith.constant dense<0.000000e+00> : vector<16x16xf32>
    %68 = tpu.matmul %65, %66, %cst_27 {dimension_numbers = #tpu.dot_dimension_numbers<[1], [1], [0], [0], [0, 0, 1, 0], [], []>} : vector<16x32xf32>, vector<16x32xf32>, vector<16x16xf32> -> vector<16x16xf32>
    %cst_28 = arith.constant 0.176776692 : f32
    %69 = vector.broadcast %cst_28 : f32 to vector<16x16xf32>
    %70 = arith.mulf %68, %69 : vector<16x16xf32>
    %cst_29 = arith.constant dense<0xFF800000> : vector<16xf32>
    %71 = vector.multi_reduction <maximumf>, %70, %cst_29 [1] : vector<16x16xf32> to vector<16xf32>
    %72 = vector.shape_cast %71 : vector<16xf32> to vector<16x1xf32>
    %73 = vector.broadcast %72 : vector<16x1xf32> to vector<16x16xf32>
    %74 = arith.subf %70, %73 : vector<16x16xf32>
    %75 = math.exp %74 : vector<16x16xf32>
    %cst_30 = arith.constant dense<0.000000e+00> : vector<16xf32>
    %76 = vector.multi_reduction <add>, %75, %cst_30 [1] : vector<16x16xf32> to vector<16xf32>
    %77 = vector.shape_cast %76 : vector<16xf32> to vector<16x1xf32>
    %cst_31 = arith.constant dense<0.000000e+00> : vector<16x32xf32>
    %78 = tpu.matmul %75, %67, %cst_31 {dimension_numbers = #tpu.dot_dimension_numbers<[1], [0], [0], [1], [0, 0, 1, 1], [], []>} : vector<16x16xf32>, vector<16x32xf32>, vector<16x32xf32> -> vector<16x32xf32>
    %79 = tpu.reciprocal %77 {approx = true} : vector<16x1xf32> -> vector<16x1xf32>
    %80 = vector.broadcast %79 : vector<16x1xf32> to vector<16x32xf32>
    %81 = arith.mulf %78, %80 : vector<16x32xf32>
    %82 = tpu.concatenate %30, %47, %64, %81 in 1 : vector<16x32xf32>, vector<16x32xf32>, vector<16x32xf32>, vector<16x32xf32> -> vector<16x128xf32>
    %c0_32 = arith.constant 0 : index
    %c0_33 = arith.constant 0 : index
    %83 = vector.load %arg8[%c0_32, %c0_33] : memref<128x128xf32, #tpu.memory_space<vmem>>, vector<128x128xf32>
    %cst_34 = arith.constant dense<0.000000e+00> : vector<16x128xf32>
    %84 = tpu.matmul %82, %83, %cst_34 {dimension_numbers = #tpu.dot_dimension_numbers<[1], [0], [0], [1], [0, 0, 1, 1], [], []>} : vector<16x128xf32>, vector<128x128xf32>, vector<16x128xf32> -> vector<16x128xf32>
    %c0_35 = arith.constant 0 : index
    %c0_36 = arith.constant 0 : index
    %85 = vector.load %arg9[%c0_35, %c0_36] : memref<1x128xf32, #tpu.memory_space<vmem>>, vector<1x128xf32>
    %86 = vector.broadcast %85 : vector<1x128xf32> to vector<16x128xf32>
    %87 = arith.addf %84, %86 : vector<16x128xf32>
    %88 = arith.index_cast %arg0 : i32 to index
    %89 = memref.load %arg1[%88] : memref<2xi32, #tpu.memory_space<smem>>
    %90 = tpu.iota {dimensions = array<i32: 0>} : vector<16x1xi32>
    %91 = vector.broadcast %89 : i32 to vector<16x1xi32>
    %92 = arith.cmpi slt, %90, %91 : vector<16x1xi32>
    %93 = arith.extui %92 : vector<16x1xi1> to vector<16x1xi32>
    %94 = arith.sitofp %93 : vector<16x1xi32> to vector<16x1xf32>
    %95 = vector.shape_cast %94 : vector<16x1xf32> to vector<1x16x1xf32>
    %cst_37 = arith.constant dense<0.000000e+00> : vector<1xf32>
    %96 = vector.multi_reduction <add>, %95, %cst_37 [1, 2] : vector<1x16x1xf32> to vector<1xf32>
    %97 = vector.shape_cast %96 : vector<1xf32> to vector<1x1x1xf32>
    %98 = vector.extract %97[0, 0, 0] : f32 from vector<1x1x1xf32>
    %cst_38 = arith.constant 1.000000e+00 : f32
    %99 = arith.maximumf %98, %cst_38 : f32
    %100 = vector.broadcast %94 : vector<16x1xf32> to vector<16x128xf32>
    %101 = arith.mulf %87, %100 : vector<16x128xf32>
    %cst_39 = arith.constant dense<0.000000e+00> : vector<128xf32>
    %102 = vector.multi_reduction <add>, %101, %cst_39 [0] : vector<16x128xf32> to vector<128xf32>
    %103 = vector.shape_cast %102 : vector<128xf32> to vector<1x128xf32>
    %cst_40 = arith.constant 1.000000e+00 : f32
    %104 = arith.divf %cst_40, %99 : f32
    %105 = vector.broadcast %104 : f32 to vector<1x128xf32>
    %106 = arith.mulf %103, %105 : vector<1x128xf32>
    %c0_41 = arith.constant 0 : index
    %c0_42 = arith.constant 0 : index
    %107 = vector.load %arg10[%c0_41, %c0_42] : memref<256x128xf32, #tpu.memory_space<vmem>>, vector<256x128xf32>
    %c0_43 = arith.constant 0 : index
    %c0_44 = arith.constant 0 : index
    %c0_45 = arith.constant 0 : index
    %108 = vector.load %arg3[%c0_43, %c0_44, %c0_45] : memref<1x1x128xf32, #tpu.memory_space<vmem>>, vector<1x1x128xf32>
    %109 = vector.shape_cast %108 : vector<1x1x128xf32> to vector<1x128xf32>
    %110 = vector.extract_strided_slice %107 {offsets = [0, 0], sizes = [128, 128], strides = [1, 1]} : vector<256x128xf32> to vector<128x128xf32>
    %cst_46 = arith.constant dense<0.000000e+00> : vector<1x128xf32>
    %111 = tpu.matmul %106, %110, %cst_46 {dimension_numbers = #tpu.dot_dimension_numbers<[1], [0], [0], [1], [0, 0, 1, 1], [], []>} : vector<1x128xf32>, vector<128x128xf32>, vector<1x128xf32> -> vector<1x128xf32>
    %112 = vector.extract_strided_slice %107 {offsets = [128, 0], sizes = [128, 128], strides = [1, 1]} : vector<256x128xf32> to vector<128x128xf32>
    %cst_47 = arith.constant dense<0.000000e+00> : vector<1x128xf32>
    %113 = tpu.matmul %109, %112, %cst_47 {dimension_numbers = #tpu.dot_dimension_numbers<[1], [0], [0], [1], [0, 0, 1, 1], [], []>} : vector<1x128xf32>, vector<128x128xf32>, vector<1x128xf32> -> vector<1x128xf32>
    %114 = arith.addf %111, %113 : vector<1x128xf32>
    %c0_48 = arith.constant 0 : index
    %c0_49 = arith.constant 0 : index
    %115 = vector.load %arg11[%c0_48, %c0_49] : memref<1x128xf32, #tpu.memory_space<vmem>>, vector<1x128xf32>
    %116 = arith.addf %114, %115 : vector<1x128xf32>
    %cst_50 = arith.constant 0.000000e+00 : f32
    %117 = vector.broadcast %cst_50 : f32 to vector<1x128xf32>
    %118 = arith.maximumf %116, %117 : vector<1x128xf32>
    %c0_51 = arith.constant 0 : index
    %c0_52 = arith.constant 0 : index
    %c0_53 = arith.constant 0 : index
    %119 = vector.load %arg12[%c0_51, %c0_52, %c0_53] : memref<1x1x128xf32, #tpu.memory_space<vmem>>, vector<1x1x128xf32>
    %120 = vector.shape_cast %119 : vector<1x1x128xf32> to vector<1x128xf32>
    %121 = vector.shape_cast %118 : vector<1x128xf32> to vector<1x1x128xf32>
    tpu.vector_store %arg12[%c0_51, %c0_52, %c0_53], %121 {strides = array<i32>} : memref<1x1x128xf32, #tpu.memory_space<vmem>>, vector<1x1x128xf32>,
    return
  }
  func.func @transform_0(%arg0: i32, %arg1: memref<2xi32, #tpu.memory_space<smem>>) -> (i32, i32, i32) {
    %c0_i32 = arith.constant 0 : i32
    %c0_i32_0 = arith.constant 0 : i32
    %c0_i32_1 = arith.constant 0 : i32
    return %arg0, %c0_i32, %c0_i32_0 : i32, i32, i32
  }
  func.func @transform_1(%arg0: i32, %arg1: memref<2xi32, #tpu.memory_space<smem>>) -> (i32, i32, i32) {
    %c0_i32 = arith.constant 0 : i32
    %c0_i32_0 = arith.constant 0 : i32
    %c0_i32_1 = arith.constant 0 : i32
    return %arg0, %c0_i32, %c0_i32_0 : i32, i32, i32
  }
  func.func @transform_2(%arg0: i32, %arg1: memref<2xi32, #tpu.memory_space<smem>>) -> (i32, i32) {
    %c0_i32 = arith.constant 0 : i32
    %c0_i32_0 = arith.constant 0 : i32
    %c0_i32_1 = arith.constant 0 : i32
    return %c0_i32, %c0_i32_0 : i32, i32
  }
  func.func @transform_3(%arg0: i32, %arg1: memref<2xi32, #tpu.memory_space<smem>>) -> (i32, i32) {
    %c0_i32 = arith.constant 0 : i32
    %c0_i32_0 = arith.constant 0 : i32
    %c0_i32_1 = arith.constant 0 : i32
    return %c0_i32, %c0_i32_0 : i32, i32
  }
  func.func @transform_4(%arg0: i32, %arg1: memref<2xi32, #tpu.memory_space<smem>>) -> (i32, i32) {
    %c0_i32 = arith.constant 0 : i32
    %c0_i32_0 = arith.constant 0 : i32
    %c0_i32_1 = arith.constant 0 : i32
    return %c0_i32, %c0_i32_0 : i32, i32
  }
  func.func @transform_5(%arg0: i32, %arg1: memref<2xi32, #tpu.memory_space<smem>>) -> (i32, i32) {
    %c0_i32 = arith.constant 0 : i32
    %c0_i32_0 = arith.constant 0 : i32
    %c0_i32_1 = arith.constant 0 : i32
    return %c0_i32, %c0_i32_0 : i32, i32
  }
  func.func @transform_6(%arg0: i32, %arg1: memref<2xi32, #tpu.memory_space<smem>>) -> (i32, i32) {
    %c0_i32 = arith.constant 0 : i32
    %c0_i32_0 = arith.constant 0 : i32
    %c0_i32_1 = arith.constant 0 : i32
    return %c0_i32, %c0_i32_0 : i32, i32
  }
  func.func @transform_7(%arg0: i32, %arg1: memref<2xi32, #tpu.memory_space<smem>>) -> (i32, i32) {
    %c0_i32 = arith.constant 0 : i32
    %c0_i32_0 = arith.constant 0 : i32
    %c0_i32_1 = arith.constant 0 : i32
    return %c0_i32, %c0_i32_0 : i32, i32
  }
  func.func @transform_8(%arg0: i32, %arg1: memref<2xi32, #tpu.memory_space<smem>>) -> (i32, i32) {
    %c0_i32 = arith.constant 0 : i32
    %c0_i32_0 = arith.constant 0 : i32
    %c0_i32_1 = arith.constant 0 : i32
    return %c0_i32, %c0_i32_0 : i32, i32
  }
  func.func @transform_9(%arg0: i32, %arg1: memref<2xi32, #tpu.memory_space<smem>>) -> (i32, i32) {
    %c0_i32 = arith.constant 0 : i32
    %c0_i32_0 = arith.constant 0 : i32
    %c0_i32_1 = arith.constant 0 : i32
    return %c0_i32, %c0_i32_0 : i32, i32
  }
  func.func @transform_10(%arg0: i32, %arg1: memref<2xi32, #tpu.memory_space<smem>>) -> (i32, i32, i32) {
    %c0_i32 = arith.constant 0 : i32
    %c0_i32_0 = arith.constant 0 : i32
    %c0_i32_1 = arith.constant 0 : i32
    return %arg0, %c0_i32, %c0_i32_0 : i32, i32, i32
  }
}

</mosaic_0001>

<bundles_post_ra>
// kernel: tpu_custom_call.1
= control target key start
LH: loop header
LB: loop body
LE: loop exit
PB: predicated region body
PF: predicated region fallthrough
CT: control target
= control target key end

     0   :  { %s3627_s0 = inlined_call_operand.hbm [shape: s32[2], index: 0, kind: input, shape index: {}]   ;;  %s3628_s1 = inlined_call_operand.hbm [shape: f32[2,16,128], index: 1, kind: input, shape index: {}]   ;;  %s3629_s2 = inlined_call_operand.vmem [shape: f32[2,1,128], index: 2, kind: input, shape index: {}]   ;;  %s3630_s3 = inlined_call_operand.hbm [shape: f32[128,128], index: 3, kind: input, shape index: {}]   ;;  %s3631_s4 = inlined_call_operand.vmem [shape: f32[1,128], index: 4, kind: input, shape index: {}]   ;;  %s3632_s5 = inlined_call_operand.hbm [shape: f32[128,384], index: 5, kind: input, shape index: {}]   ;;  %s3633_s6 = inlined_call_operand.vmem [shape: f32[1,384], index: 6, kind: input, shape index: {}]   ;;  %s3634_s7 = inlined_call_operand.hbm [shape: f32[128,128], index: 7, kind: input, shape index: {}]   ;;  %s3635_s8 = inlined_call_operand.vmem [shape: f32[1,128], index: 8, kind: input, shape index: {}]   ;;  %s3636_s9 = inlined_call_operand.hbm [shape: f32[256,128], index: 9, kind: input, shape index: {}]   ;;  %s3637_s10 = inlined_call_operand.vmem [shape: f32[1,128], index: 10, kind: input, shape index: {}]   ;;  %s3638_s11 = inlined_call_operand.hbm [shape: f32[2,1,128], index: 11, kind: output, shape index: {}]  }
   0x1   :  { %3649 = sst [smem:[#allocation21_spill]] %s3637_s10  ;;  %s2844_s19 = scalar_lea.hbm %s3627_s0, 16 }
   0x2   :  { %3650 = sst [smem:[#allocation22_spill]] %s3638_s11  ;;  %p2845_p0 = scmp.ne.s32.totalorder %s3627_s0, %s2844_s19 }
   0x3   :  { %p2848_p1 = scmp.lt.u32.totalorder %s2844_s19, %s3627_s0 }
   0x5   :  { %p2850_p2 = pnand %p2848_p1, %p2845_p0 }
   0x7   :  { %2853 = shalt.err (!%p2850_p2)  }
   0x8   :  { %s3074_s24 = smov [#allocation3]  }
   0x9   :  { %17 = dma.hbm_to_smem %s3627_s0, 16, %s3074_s24, [#allocation2] }
   0xa   :  { %3040 = dma.done.wait [#allocation2], 16 }
   0xb   :  { %3041 = vsyncadd [#allocation2], 4294967280 }
   0xc   :  { %19 = sfence }
   0xd   :  { %20 = vsyncpa [#allocation5], 0 }
   0xe   :  { %22 = vsyncpa [#allocation5 + $0x1], 0 }
   0xf   :  { %23 = vsyncpa [#allocation8], 0 }
  0x10   :  { %24 = vsyncpa [#allocation11], 0 }
  0x11   :  { %25 = vsyncpa [#allocation6], 0 }
  0x12   :  { %27 = vsyncpa [#allocation6 + $0x1], 0  ;;  %s3164_s27 = smov 0   ;;  %s3166_s28 = smov 0  }
  0x13   :  { %s3168_s29 = smov 0   ;;  %s3170_s30 = smov 0  }
  0x14 LB: > { %3651 = sst [smem:[#allocation19_spill]] %s3060_s27  ;;  %s3185_s0 = sadd.s32 4294967295, %s3072_s30   ;;  %s3072_s30 = sphi %s3170_s30, %s3680_s30   ;;  %s3068_s29 = sphi %s3168_s29, %s3679_s29   ;;  %s3064_s28 = sphi %s3166_s28, %s3678_s28   ;;  %s3060_s27 = sphi %s3164_s27, %s3677_s27  }
  0x15   : > { %s2047_s12 = sadd.s32 4294967294, %s3072_s30   ;;  %p53_p3 = scmp.ne.s32.totalorder %s3064_s28, %s3060_s27 }
  0x16   : > { %p3639_p4 = scmp.eq.s32.totalorder %s3185_s0, 0  ;;  %p277_p6 = scmp.eq.s32.totalorder %s2047_s12, 1 }
  0x17   : > { %p2048_p8 = scmp.ge.s32.totalorder %s3072_s30, 1  ;;  %p284_p10 = scmp.lt.s32.totalorder %s3072_s30, 3 }
  0x18   : > { %p3194_p7 = por %p3639_p4, %p53_p3  ;;  %p3199_p9 = por %p277_p6, %p53_p3 }
  0x19   : > { %p3204_p11 = pnand %p2048_p8, %p284_p10  ;;  %s3075_s16 = smov [#allocation7]  }
  0x1a   : > { %s3652_s13 = scalar_select %p3194_p7, 1, 0 }
  0x1b   : > { %s3653_s14 = scalar_select %p3199_p9, 1, 0 }
  0x1c   : > { %s3655_s15 = scalar_select %p3204_p11, 1, 0 }
  0x1d   : > { %3654 = sst [smem:[#allocation20_spill]] %s3653_s14  ;;  %s296_s17 = sshll.u32 %s3075_s16, 4  ;;  %s3208_s17 = int_to_ptr.vmem [resolvable:$true] %s296_s17 }
  0x1e   : > { %p2686_p12 = pneg %p3204_p11  ;;  %s3076_s19 = smov [#allocation10]  }
  0x1f   : > { %s328_s20 = sshll.u32 %s3076_s19, 4  ;;  %s3077_s21 = smov [#allocation9]   ;;  %s3219_s20 = int_to_ptr.vmem [resolvable:$true] %s328_s20 }
  0x20   : > { %p3215_p0 = pnand %p2686_p12, %p3639_p4  ;;  %s3221_s22 = sshll.u32 %s3077_s21, 4  ;;  %s313_s22 = int_to_ptr.vmem [resolvable:$true] %s3221_s22 }
  0x21   : > { %s2854_s25 = scalar_lea.hbm %s3630_s3, 2048 }
  0x22   : > { %p2855_p1 = scmp.ne.s32.totalorder %s3630_s3, %s2854_s25  ;;  %p3231_p2 = pneg %p3215_p0 }
  0x23   : > { %p2861_p8 = scmp.lt.u32.totalorder %s2854_s25, %s3630_s3 }
  0x24   : > { %p2857_p3 = pnand %p3231_p2, %p2855_p1 }
  0x26   : > { %p2858_p6 = pneg %p2857_p3 }
  0x28   : > { %p2863_p10 = pnand %p2861_p8, %p2858_p6 }
  0x2a   : > { %2866 = shalt.err (!%p2863_p10)
}
  0x2b   : > { %s2867_s23 = scalar_lea.vmem %s3208_s17, 2048  ;;  %p2875_p5 = scmp.lt.s32.totalorder %s3208_s17, %s3208_s17 }
  0x2c   : > { %p2868_p12 = scmp.ne.s32.totalorder %s3208_s17, %s2867_s23  ;;  %p2876_p9 = scmp.lt.s32.totalorder %s2867_s23, %s2867_s23 }
  0x2e   : > { %p2870_p13 = pnand %p2868_p12, %p3231_p2  ;;  %p2877_p1 = por %p2876_p9, %p2875_p5 }
  0x30   : > { %p2871_p4 = pneg %p2870_p13 }
  0x32   : > { %p2878_p3 = pnand %p2877_p1, %p2871_p4 }
  0x34   : > { %2881 = shalt.err (!%p2878_p3)
}
  0x35   : > { %s3645_s24 = smov 128   ;;  %s3647_s25 = smov 8  }
  0x36   : > { %2689 = dma.hbm_to_vmem [thread:$0]  (!%p3215_p0), %s3630_s3, 2048, %s3208_s17, [#allocation8], %s3645_s24, %s3645_s24, %s3647_s25  }
  0x37   : > { %s2882_s23 = scalar_lea.hbm %s3634_s7, 2048 }
  0x38   : > { %p2883_p4 = scmp.ne.s32.totalorder %s3634_s7, %s2882_s23  ;;  %p2889_p13 = scmp.lt.u32.totalorder %s2882_s23, %s3634_s7 }
  0x3a   : > { %p2885_p5 = pnand %p2883_p4, %p3231_p2 }
  0x3c   : > { %p2886_p9 = pneg %p2885_p5 }
  0x3e   : > { %p2891_p6 = pnand %p2889_p13, %p2886_p9 }
  0x40   : > { %2894 = shalt.err (!%p2891_p6)
}
  0x41   : > { %s2895_s17 = scalar_lea.vmem %s3219_s20, 2048  ;;  %p2903_p1 = scmp.lt.s32.totalorder %s3219_s20, %s3219_s20 }
  0x42   : > { %p2896_p8 = scmp.ne.s32.totalorder %s3219_s20, %s2895_s17  ;;  %p2904_p3 = scmp.lt.s32.totalorder %s2895_s17, %s2895_s17 }
  0x44   : > { %p2898_p10 = pnand %p2896_p8, %p3231_p2  ;;  %p2905_p4 = por %p2904_p3, %p2903_p1 }
  0x46   : > { %p2899_p12 = pneg %p2898_p10 }
  0x48   : > { %p2906_p5 = pnand %p2905_p4, %p2899_p12 }
  0x4a   : > { %2909 = shalt.err (!%p2906_p5)
}
  0x4b   : > { %2695 = dma.hbm_to_vmem [thread:$0]  (!%p3215_p0), %s3634_s7, 2048, %s3219_s20, [#allocation11], %s3645_s24, %s3645_s24, %s3647_s25  }
  0x4c   : > { %s2910_s26 = scalar_lea.hbm %s3632_s5, 6144 }
  0x4d   : > { %p2911_p9 = scmp.ne.s32.totalorder %s3632_s5, %s2910_s26  ;;  %p2917_p8 = scmp.lt.u32.totalorder %s2910_s26, %s3632_s5 }
  0x4f   : > { %p2913_p13 = pnand %p2911_p9, %p3231_p2 }
  0x51   : > { %p2914_p6 = pneg %p2913_p13 }
  0x53   : > { %p2919_p10 = pnand %p2917_p8, %p2914_p6 }
  0x55   : > { %2922 = shalt.err (!%p2919_p10)
}
  0x56   : > { %s2923_s17 = scalar_lea.vmem %s313_s22, 6144  ;;  %p2931_p4 = scmp.lt.s32.totalorder %s313_s22, %s313_s22 }
  0x57   : > { %p2924_p12 = scmp.ne.s32.totalorder %s313_s22, %s2923_s17  ;;  %p2932_p5 = scmp.lt.s32.totalorder %s2923_s17, %s2923_s17 }
  0x59   : > { %p2926_p1 = pnand %p2924_p12, %p3231_p2  ;;  %p2933_p7 = por %p2932_p5, %p2931_p4 }
  0x5b   : > { %p2927_p3 = pneg %p2926_p1 }
  0x5d   : > { %p2934_p11 = pnand %p2933_p7, %p2927_p3 }
  0x5f   : > { %2937 = shalt.err (!%p2934_p11)
}
  0x60   : > { %s3080_s20 = smov 384   ;;  %s3081_s10 = smov 24  }
  0x61   : > { %2692 = dma.hbm_to_vmem [thread:$0]  (!%p3215_p0), %s3632_s5, 6144, %s313_s22, [#allocation8], %s3080_s20, %s3080_s20, %s3081_s10  }
  0x62   : > { %s3082_s14 = smov [#allocation12]   ;;  %s2938_s21 = scalar_lea.hbm %s3636_s9, 4096 }
  0x63   : > { %s344_s26 = sshll.u32 %s3082_s14, 4  ;;  %p2939_p7 = scmp.ne.s32.totalorder %s3636_s9, %s2938_s21  ;;  %s345_s26 = int_to_ptr.vmem [resolvable:$true] %s344_s26 }
  0x64   : > { %p2945_p13 = scmp.lt.u32.totalorder %s2938_s21, %s3636_s9 }
  0x65   : > { %p2941_p11 = pnand %p2939_p7, %p3231_p2 }
  0x67   : > { %p2942_p9 = pneg %p2941_p11 }
  0x69   : > { %p2947_p6 = pnand %p2945_p13, %p2942_p9 }
  0x6b   : > { %2950 = shalt.err (!%p2947_p6)
}
  0x6c   : > { %s2951_s22 = scalar_lea.vmem %s345_s26, 4096  ;;  %p2959_p1 = scmp.lt.s32.totalorder %s345_s26, %s345_s26 }
  0x6d   : > { %p2952_p8 = scmp.ne.s32.totalorder %s345_s26, %s2951_s22  ;;  %p2960_p3 = scmp.lt.s32.totalorder %s2951_s22, %s2951_s22 }
  0x6f   : > { %p2954_p10 = pnand %p2952_p8, %p3231_p2  ;;  %p2961_p4 = por %p2960_p3, %p2959_p1 }
  0x71   : > { %p2955_p12 = pneg %p2954_p10 }
  0x73   : > { %p2962_p5 = pnand %p2961_p4, %p2955_p12 }
  0x75   : > { %2965 = shalt.err (!%p2962_p5)
}
  0x76   : > { %s3658_s20 = smov 8   ;;  %s3659_s10 = smov 128  }
  0x77   : > { %2698 = dma.hbm_to_vmem [thread:$0]  (!%p3215_p0), %s3636_s9, 4096, %s345_s26, [#allocation11], %s3659_s10, %s3659_s10, %s3658_s20  }
  0x78   : > { %s3322_s16 = sadd.s32 1, %s3072_s30   ;;  %s40_s18 = sadd.s32 1, %s3068_s29 }
  0x79   : > { %s37_s11 = ssub.s32 %s3072_s30, %s3322_s16  ;;  %p47_p2 = scmp.ne.s32.totalorder %s3068_s29, %s3064_s28 }
  0x7a   : > { %p38_p7 = scmp.eq.s32.totalorder %s37_s11, 0  ;;  %p48_p11 = scmp.eq.s32.totalorder %s3072_s30, 0 }
  0x7b   : > { %p3660_p9 = scmp.eq.s32.totalorder %s3185_s0, 1  ;;  %p2711_p6 = scmp.lt.s32.totalorder %s3072_s30, 2 }
  0x7c   : > { %s3338_s14 = scalar_select %p38_p7, %s3068_s29, %s40_s18  }
  0x7d   : > { %p3332_p13 = por %p3660_p9, %p47_p2  ;;  %p49_p8 = por %p48_p11, %p47_p2 }
  0x7e   : > { %s361_s12 = sand.u32 1, %s3068_s29   ;;  %s2094_s26 = sshll.u32 %s3072_s30, 8 }
  0x7f   : > { %s2054_s19 = sshll.u32 %s361_s12, 4  ;;  %s3345_s17 = scalar_lea.hbm %s3628_s1, %s2094_s26 }
  0x80   : > { %s365_s22 = scalar_lea.vmem [#allocation4], %s2054_s19  ;;  %p3349_p0 = pnand %p2711_p6, %p49_p8 }
  0x81   : > { %s372_s24 = sshll.u32 %s365_s22, 4  ;;  %s3353_s18 = scalar_lea.sflag [#allocation5], %s361_s12  ;;  %s3347_s24 = int_to_ptr.vmem [resolvable:$true] %s372_s24 }
  0x82   : > { %s2966_s11 = scalar_lea.hbm %s3345_s17, 256  ;;  %p2968_p12 = pneg %p3349_p0 }
  0x83   : > { %p2967_p10 = scmp.ne.s32.totalorder %s3345_s17, %s2966_s11  ;;  %s2971_s21 = scalar_lea.hbm %s3628_s1, 512 }
  0x84   : > { %p2972_p4 = scmp.lt.u32.totalorder %s3345_s17, %s3628_s1  ;;  %p2973_p5 = scmp.lt.u32.totalorder %s2971_s21, %s2966_s11 }
  0x85   : > { %p2969_p1 = pnand %p2968_p12, %p2967_p10  ;;  %p2975_p7 = scmp.lt.u32.totalorder %s2966_s11, %s3345_s17 }
  0x86   : > { %p2974_p2 = por %p2973_p5, %p2972_p4 }
  0x87   : > { %p2970_p3 = pneg %p2969_p1 }
  0x88   : > { %p2976_p11 = por %p2975_p7, %p2974_p2 }
  0x8a   : > { %p2977_p9 = pnand %p2976_p11, %p2970_p3 }
  0x8c   : > { %2980 = shalt.err (!%p2977_p9)
}
  0x8d   : > { %s2981_s12 = scalar_lea.vmem %s3347_s24, 256  ;;  %s3083_s19 = smov [#allocation4]  }
  0x8e   : > { %p2982_p6 = scmp.ne.s32.totalorder %s3347_s24, %s2981_s12  ;;  %s2986_s26 = sshll.u32 %s3083_s19, 4  ;;  %s2987_s26 = int_to_ptr.vmem [resolvable:$false] %s2986_s26 }
  0x8f   : > { %s2988_s23 = scalar_lea.vmem %s2987_s26, 512  ;;  %p2989_p1 = scmp.lt.s32.totalorder %s3347_s24, %s2987_s26 }
  0x90   : > { %p2984_p8 = pnand %p2982_p6, %p2968_p12  ;;  %p2990_p4 = scmp.lt.s32.totalorder %s2988_s23, %s2981_s12 }
  0x92   : > { %p2985_p10 = pneg %p2984_p8  ;;  %p2991_p5 = por %p2990_p4, %p2989_p1 }
  0x94   : > { %p2992_p2 = pnand %p2991_p5, %p2985_p10 }
  0x96   : > { %2995 = shalt.err (!%p2992_p2)
}
  0x97   : > { %2702 = dma.hbm_to_vmem [thread:$0]  (!%p3349_p0), %s3345_s17, 256, %s3347_s24, %s3353_s18, %s3659_s10, %s3659_s10, %s3658_s20  }
  0x98   : > { %p3663_p12 = scmp.ne.s32.totalorder %s3655_s15, 0 }
  0x99   : > { %s3387_s11 = sand.u32 (!%p3663_p12), 1, %s3064_s28   ;;  %p3664_p3 = scmp.ne.s32.totalorder (!%p3663_p12), %s3652_s13, 0 }
  0x9a   : > { %390 = sbr.rel (%p3663_p12) target bundleno = 2973 (0xb9d), region = 60  ;;  %s2058_s21 = sshll.u32 (!%p3663_p12), %s3387_s11, 4 }
  0x9b   : > { %s393_s22 = scalar_lea.sflag (!%p3663_p12), [#allocation5], %s3387_s11  ;;  %s3391_s12 = scalar_lea.vmem (!%p3663_p12), [#allocation4], %s2058_s21 }
  0xa1   : > { %3043 = dma.done.wait (%p3664_p3), %s393_s22, 256  }
  0xa2   : > { %3045 = vsyncadd (%p3664_p3), %s393_s22, 4294967040  ;;  %p3665_p0 = scmp.eq.s32.totalorder %s3185_s0, 0 }
  0xa4   : > { %3047 = dma.done.wait (%p3665_p0), [#allocation8], 8192   ;;  %p3666_p7 = pmov %p3665_p0 }
  0xa5   : > { %p3667_p11 = pmov %p3665_p0 }
  0xa6   : > { %3049 = vsyncadd (%p3666_p7), [#allocation8], 4294959104 }
  0xa7   : > { %3051 = dma.done.wait (%p3667_p11), [#allocation11], 6144   ;;  %p3668_p9 = pmov %p3665_p0 }
  0xa8   : > { %v456_v0 = vld [vmem:[#allocation7] sm:$0xff]  ;;  %v457_v1 = vld [vmem:[#allocation7 + $0x8] sm:$0xff]  ;;  %v458_v2 = vld [vmem:[#allocation7 + $0x10] sm:$0xff]  ;;  %vm773_vm0 = vcmask 261120   ;;  %s3085_s17 = smov 96   ;;  %vm863_vm2 = vcmask 130048  }
  0xa9   : > { %3053 = vsyncadd (%p3668_p9), [#allocation11], 4294961152  ;;  %v2446_v3 = vpack.c.bf16 %v457_v1, %v456_v0  ;;  %v459_v4 = vld [vmem:[#allocation7 + $0x18] sm:$0xff]  ;;  %v460_v6 = vld [vmem:[#allocation7 + $0x20] sm:$0xff]  ;;  %s3086_s24 = smov 64   ;;  %s3087_s25 = smov 32  }
  0xaa   : > { %v2450_v5 = vpack.c.bf16 %v459_v4, %v458_v2  ;;  %v461_v7 = vld [vmem:[#allocation7 + $0x28] sm:$0xff]  ;;  %v462_v9 = vld [vmem:[#allocation7 + $0x30] sm:$0xff]  ;;  %v463_v10 = vld [vmem:[#allocation7 + $0x38] sm:$0xff]  ;;  %s1705_s18 = sld [smem:[#allocation3 + %s3185_s0]]  ;;  %vm1716_vm3 = vcmask 7168   ;;  %s3089_s26 = smov 1.0  }
  0xab   : > { %2447 = vmatprep.subr.bf16.mxu0 %v2446_v3  ;;  %v2454_v8 = vpack.c.bf16 %v461_v7, %v460_v6  ;;  %v454_v11 = vld [vmem:[%s3391_s12] sm:$0xff]  ;;  %v557_v12 = vld [vmem:[#allocation9 + $0x8] sm:$0xff]  ;;  %v559_v16 = vld [vmem:[#allocation9 + $0x18] sm:$0xff]  ;;  %v2458_v21 = vpack.c.bf16 %v463_v10, %v462_v9  ;;  %vm1601_vm6 = vcmask 523264   ;;  %vm1604_vm7 = vcmask 785408   ;;  %p451_p6 = scmp.lt.s32.totalorder %s3185_s0, 1 }
  0xac   : > { %2449 = vmatpush3.bf16.msra.mxu0 %v2446_v3  ;;  %2247 = vmatprep.mubr.f32.mxu0 %v454_v11  ;;  %v560_v13 = vld [vmem:[#allocation9 + $0x20] sm:$0xff]  ;;  %v563_v18 = vld [vmem:[#allocation9 + $0x38] sm:$0xff]  ;;  %v566_v19 = vld [vmem:[#allocation9 + $0x50] sm:$0xff]  ;;  %vm3090_vm8 = vmmov 0   ;;  %s3672_s22 = sld [smem:[#allocation22_spill]] }
  0xad   : > { %2451 = vmatprep.subr.bf16.mxu0 %v2450_v5  ;;  %v556_v14 = vld [vmem:[#allocation9] sm:$0xff]  ;;  %v2478_v15 = vpack.c.bf16 %v560_v13, %v557_v12  ;;  %v562_v20 = vld [vmem:[#allocation9 + $0x30] sm:$0xff]  ;;  %v2482_v23 = vpack.c.bf16 %v566_v19, %v563_v18  ;;  %v565_v24 = vld [vmem:[#allocation9 + $0x48] sm:$0xff]  ;;  %s452_s21 = scalar_select %p451_p6, %s3185_s0, 1 }
  0xae   : > { %v2480_v17 = vpack.c.bf16 %v559_v16, %v556_v14  ;;  %v464_v22 = vld [vmem:[#allocation7 + $0x40] sm:$0xff]  ;;  %v465_v25 = vld [vmem:[#allocation7 + $0x48] sm:$0xff]  ;;  %v2484_v26 = vpack.c.bf16 %v565_v24, %v562_v20  ;;  %v571_v31 = vld [vmem:[#allocation9 + $0x78] sm:$0xff] }
  0xaf   : > { %2479 = vmatprep.subr.bf16.mxu1 %v2478_v15  ;;  %v569_v27 = vld [vmem:[#allocation9 + $0x68] sm:$0xff]  ;;  %v572_v28 = vld [vmem:[#allocation9 + $0x80] sm:$0xff]  ;;  %v575_v32 = vld [vmem:[#allocation9 + $0x98] sm:$0xff]  ;;  %v2462_v34 = vpack.c.bf16 %v465_v25, %v464_v22  ;;  %s453_s13 = scalar_lea.vmem %s3629_s2, %s452_s21 }
  0xb0   : > { %2453 = vmatpush3.bf16.msra.mxu0 %v2450_v5  ;;  %2481 = vmatpush1.bf16.msra.mxu1 %v2480_v17  ;;  %v2486_v29 = vpack.c.bf16 %v572_v28, %v569_v27  ;;  %v568_v30 = vld [vmem:[#allocation9 + $0x60] sm:$0xff]  ;;  %v578_v33 = vld [vmem:[#allocation9 + $0xb0] sm:$0xff]  ;;  %v467_v36 = vld [vmem:[#allocation7 + $0x58] sm:$0xff] }
  0xb1   : > { %2455 = vmatprep.subr.bf16.mxu0 %v2454_v8  ;;  %2483 = vmatprep.subr.bf16.mxu1 %v2482_v23  ;;  %v466_v35 = vld [vmem:[#allocation7 + $0x50] sm:$0xff]  ;;  %v2488_v37 = vpack.c.bf16 %v571_v31, %v568_v30  ;;  %v2490_v38 = vpack.c.bf16 %v578_v33, %v575_v32  ;;  %v577_v40 = vld [vmem:[#allocation9 + $0xa8] sm:$0xff]  ;;  %v584_v42 = vld [vmem:[#allocation9 + $0xe0] sm:$0xff] }
  0xb2   : > { %v574_v39 = vld [vmem:[#allocation9 + $0x90] sm:$0xff]  ;;  %v581_v41 = vld [vmem:[#allocation9 + $0xc8] sm:$0xff]  ;;  %v2466_v43 = vpack.c.bf16 %v467_v36, %v466_v35  ;;  %v468_v44 = vld [vmem:[#allocation7 + $0x60] sm:$0xff] }
  0xb3   : > { %v469_v45 = vld [vmem:[#allocation7 + $0x68] sm:$0xff]  ;;  %v2492_v46 = vpack.c.bf16 %v577_v40, %v574_v39  ;;  %v2494_v47 = vpack.c.bf16 %v584_v42, %v581_v41  ;;  %v580_v48 = vld [vmem:[#allocation9 + $0xc0] sm:$0xff]  ;;  %v583_v49 = vld [vmem:[#allocation9 + $0xd8] sm:$0xff]  ;;  %v606_v42 = vlaneseq }
  0xb4   : > { %2457 = vmatpush3.bf16.msra.mxu0 %v2454_v8  ;;  %2485 = vmatpush1.bf16.msra.mxu1 %v2484_v26  ;;  %v587_v50 = vld [vmem:[#allocation9 + $0xf8] sm:$0xff]  ;;  %v590_v51 = vld [vmem:[#allocation9 + $0x110] sm:$0xff]  ;;  %v2470_v52 = vpack.c.bf16 %v469_v45, %v468_v44  ;;  %v2496_v55 = vpack.c.bf16 %v583_v49, %v580_v48  ;;  %v589_v58 = vld [vmem:[#allocation9 + $0x108] sm:$0xff] }
  0xb5   : > { %2459 = vmatprep.subr.bf16.mxu0 %v2458_v21  ;;  %2487 = vmatprep.subr.bf16.mxu1 %v2486_v29  ;;  %v470_v53 = vld [vmem:[#allocation7 + $0x70] sm:$0xff]  ;;  %v471_v54 = vld [vmem:[#allocation7 + $0x78] sm:$0xff]  ;;  %v2498_v56 = vpack.c.bf16 %v590_v51, %v587_v50  ;;  %v593_v59 = vld [vmem:[#allocation9 + $0x128] sm:$0xff] }
  0xb6   : > { %v586_v57 = vld [vmem:[#allocation9 + $0xf0] sm:$0xff]  ;;  %v596_v60 = vld [vmem:[#allocation9 + $0x140] sm:$0xff]  ;;  %v2474_v61 = vpack.c.bf16 %v471_v54, %v470_v53  ;;  %v561_v63 = vld [vmem:[#allocation9 + $0x28] sm:$0xff] }
  0xb7   : > { %v558_v62 = vld [vmem:[#allocation9 + $0x10] sm:$0xff]  ;;  %v2500_v0 = vpack.c.bf16 %v589_v58, %v586_v57  ;;  %v2502_v1 = vpack.c.bf16 %v596_v60, %v593_v59  ;;  %v592_v2 = vld [vmem:[#allocation9 + $0x120] sm:$0xff]  ;;  %v595_v3 = vld [vmem:[#allocation9 + $0x138] sm:$0xff] }
  0xb8   : > { %2461 = vmatpush3.bf16.msra.mxu0 %v2458_v21  ;;  %2489 = vmatpush1.bf16.msra.mxu1 %v2488_v37  ;;  %v2510_v4 = vpack.c.bf16 %v561_v63, %v558_v62  ;;  %v564_v5 = vld [vmem:[#allocation9 + $0x40] sm:$0xff]  ;;  %v567_v6 = vld [vmem:[#allocation9 + $0x58] sm:$0xff]  ;;  %v2504_v7 = vpack.c.bf16 %v595_v3, %v592_v2  ;;  %v570_v10 = vld [vmem:[#allocation9 + $0x70] sm:$0xff] }
  0xb9   : > { %2463 = vmatprep.subr.bf16.mxu0 %v2462_v34  ;;  %2491 = vmatprep.subr.bf16.mxu1 %v2490_v38  ;;  %v455_v8 = vld [vmem:[%s3391_s12 + $0x8] sm:$0xff]  ;;  %v2514_v9 = vpack.c.bf16 %v567_v6, %v564_v5  ;;  %v576_v13 = vld [vmem:[#allocation9 + $0xa0] sm:$0xff]  ;;  %v582_v16 = vld [vmem:[#allocation9 + $0xd0] sm:$0xff] }
  0xba   : > { %v573_v11 = vld [vmem:[#allocation9 + $0x88] sm:$0xff]  ;;  %v579_v14 = vld [vmem:[#allocation9 + $0xb8] sm:$0xff]  ;;  %v588_v19 = vld [vmem:[#allocation9 + $0x100] sm:$0xff] }
  0xbb   : > { %v2518_v12 = vpack.c.bf16 %v573_v11, %v570_v10  ;;  %v2522_v15 = vpack.c.bf16 %v579_v14, %v576_v13  ;;  %v585_v17 = vld [vmem:[#allocation9 + $0xe8] sm:$0xff]  ;;  %v591_v20 = vld [vmem:[#allocation9 + $0x118] sm:$0xff]  ;;  %v594_v22 = vld [vmem:[#allocation9 + $0x130] sm:$0xff] }
  0xbc   : > { %2465 = vmatpush3.bf16.msra.mxu0 %v2462_v34  ;;  %2493 = vmatpush1.bf16.msra.mxu1 %v2492_v46  ;;  %v2526_v18 = vpack.c.bf16 %v585_v17, %v582_v16  ;;  %v2530_v21 = vpack.c.bf16 %v591_v20, %v588_v19  ;;  %v597_v23 = vld [vmem:[#allocation9 + $0x148] sm:$0xff]  ;;  %v599_v25 = vld [vmem:[#allocation9 + $0x158] sm:$0xff]  ;;  %v602_v26 = vld [vmem:[#allocation9 + $0x170] sm:$0xff]  ;;  %v3084_v34 = vmov 0.0  }
  0xbd   : > { %2467 = vmatprep.subr.bf16.mxu0 %v2466_v43  ;;  %2495 = vmatprep.subr.bf16.mxu1 %v2494_v47  ;;  %v2534_v24 = vpack.c.bf16 %v597_v23, %v594_v22  ;;  %v2506_v27 = vpack.c.bf16 %v602_v26, %v599_v25  ;;  %v598_v28 = vld [vmem:[#allocation9 + $0x150] sm:$0xff]  ;;  %v601_v29 = vld [vmem:[#allocation9 + $0x168] sm:$0xff]  ;;  %v600_v31 = vld [vmem:[#allocation9 + $0x160] sm:$0xff] }
  0xbe   : > { %v2508_v30 = vpack.c.bf16 %v601_v29, %v598_v28  ;;  %v603_v32 = vld [vmem:[#allocation9 + $0x178] sm:$0xff]  ;;  %685 = vmatprep.mubr.f32.mxu1 %v3084_v34  ;;  %v2063_v35 = vld [vmem:[%s3631_s4] ss:$0 sm:$0xff]  ;;  %vm3428_vm1 = vmpackc.low %vm773_vm0, %vm773_vm0 }
  0xbf   : > { %v2538_v33 = vpack.c.bf16 %v603_v32, %v600_v31  ;;  %v604_v45 = vld [vmem:[%s3633_s6] sm:$0x7] }
  0xc0   : > { %2469 = vmatpush3.bf16.msra.mxu0 %v2466_v43  ;;  %2497 = vmatpush1.bf16.msra.mxu1 %v2496_v55  ;;  %v3412_v43 = vshrl.u32 %v606_v42, 7 }
  0xc1   : > { %2471 = vmatprep.subr.bf16.mxu0 %v2470_v52  ;;  %2499 = vmatprep.subr.bf16.mxu1 %v2498_v56 }
  0xc2   : > { %v608_v44 = vsub.s32 0, %v3412_v43  ;;  %v616_v46 = vsub.s32 2, %v3412_v43  ;;  %v612_v48 = vsub.s32 1, %v3412_v43 }
  0xc4   : > { %2473 = vmatpush3.bf16.msra.mxu0 %v2470_v52  ;;  %2501 = vmatpush1.bf16.msra.mxu1 %v2500_v0  ;;  %v609_v47 = vrot.slane %v604_v45, %v608_v44  ;;  %v617_v49 = vrot.slane %v604_v45, %v616_v46  ;;  %v613_v54 = vrot.slane %v604_v45, %v612_v48 }
  0xc5   : > { %2475 = vmatprep.subr.bf16.mxu0 %v2474_v61  ;;  %2503 = vmatprep.subr.bf16.mxu1 %v2502_v1 }
  0xc8   : > { %2477 = vmatpush3.bf16.msra.mxu0 %v2474_v61  ;;  %2505 = vmatpush1.bf16.msra.mxu1 %v2504_v7 }
  0xc9   : > { %2511 = vmatprep.subr.bf16.mxu0 %v2510_v4  ;;  %2507 = vmatprep.subr.bf16.mxu1 %v2506_v27 }
  0xcb   : > { %2248 = vmatmul.mubr.f32.vlgmr.msra.gmra.mrb[0].mxu0 %v455_v8 }
  0xcc   : > { %2513 = vmatpush3.bf16.msra.mxu0 %v2510_v4  ;;  %2509 = vmatpush1.bf16.msra.mxu1 %v2508_v30 }
  0xcd   : > { %2515 = vmatprep.subr.bf16.mxu0 %v2514_v9 }
  0xd0   : > { %2517 = vmatpush3.bf16.msra.mxu0 %v2514_v9 }
  0xd1   : > { %2519 = vmatprep.subr.bf16.mxu0 %v2518_v12 }
  0xd4   : > { %2521 = vmatpush3.bf16.msra.mxu0 %v2518_v12 }
  0xd5   : > { %2523 = vmatprep.subr.bf16.mxu0 %v2522_v15 }
  0xd8   : > { %2525 = vmatpush3.bf16.msra.mxu0 %v2522_v15 }
  0xd9   : > { %2527 = vmatprep.subr.bf16.mxu0 %v2526_v18 }
  0xdc   : > { %2529 = vmatpush3.bf16.msra.mxu0 %v2526_v18 }
  0xdd   : > { %2531 = vmatprep.subr.bf16.mxu0 %v2530_v21 }
  0xe0   : > { %2533 = vmatpush3.bf16.msra.mxu0 %v2530_v21 }
  0xe1   : > { %2535 = vmatprep.subr.bf16.mxu0 %v2534_v24 }
  0xe4   : > { %2537 = vmatpush3.bf16.msra.mxu0 %v2534_v24 }
  0xe5   : > { %2539 = vmatprep.subr.bf16.mxu0 %v2538_v33 }
  0xe8   : > { %2541 = vmatpush3.bf16.msra.mxu0 %v2538_v33 }
 0x19e   : > { %v2249_v36 = vpop.f32.mrb[0].mxu0 }
 0x19f   : > { %v551_v37 = vadd.f32 %v2249_v36, %v2063_v35  ;;  %v545_v38 = vpop.f32.mrb[1].mxu0 }
 0x1a0   : > { %v546_v39 = vadd.f32 %v2063_v35, %v545_v38 }
 0x1a1   : > { %v555_v41 = vmax.f32 %v551_v37, 0.0 }
 0x1a2   : > { %v554_v40 = vmax.f32 %v546_v39, 0.0 }
 0x1a4   : > { %686 = vmatmul.mubr.f32.vlgmr.msra.gmra.mrb[0].mxu1 %v554_v40  ;;  %2282 = vmatprep.mubr.f32.mxu0 %v554_v40 }
 0x1a5   : > { %2283 = vmatmul.mubr.f32.vlgmr.msra.gmra.mrb[2].mxu0 %v555_v41  ;;  %691 = vmatprep.mubr.f32.mxu1 %v3084_v34 }
 0x1a8   : > { %692 = vmatmul.mubr.f32.gmra.mrb[2].mxu1 %v555_v41 }
 0x277   : > { %v687_v50 = vpop.f32.mrb[0].mxu1 }
 0x278   : > { %v3420_v51 = vadd.f32 %v687_v50, %v609_v47  ;;  %v689_v52 = vpop.f32.mrb[1].mxu1  ;;  %v2284_v53 = vpop.f32.mrb[2].mxu0 }
 0x279   : > { %v770_v55 = vadd.f32 %v2284_v53, %v617_v49  ;;  %v764_v56 = vpop.f32.mrb[3].mxu0  ;;  %v690_v62 = vadd.f32 %v689_v52, %v613_v54 }
 0x27a   : > { %v765_v57 = vadd.f32 %v764_v56, %v617_v49  ;;  %2289 = vmatprep.mubr.msk.f32.mxu1 %vm773_vm0, %v3420_v51 }
 0x27b   : > { %v693_v58 = vpop.f32.mrb[2].mxu1 }
 0x27c   : > { %v695_v59 = vpop.f32.mrb[3].mxu1  ;;  %v2548_v60 = vpack.c.bf16 %v770_v55, %v765_v57  ;;  %v3424_v61 = vpack.i.bf16 %v770_v55, %v765_v57  ;;  %v3442_v3 = vadd.f32 %v693_v58, %v609_v47 }
 0x27d   : > { %v696_v63 = vadd.f32 %v695_v59, %v613_v54 }
 0x27f   : > { %v3432_v1 = vpack.i.bf16 %v696_v63, %v690_v62  ;;  %v2542_v2 = vpack.c.bf16 %v696_v63, %v690_v62 }
 0x281   : > { %2766 = vrot.lane.b32.xlu1 %v3432_v1, %s3085_s17  ;;  %2544 = vmatprep.subr.msk.bf16.mxu1 %vm3428_vm1, %v2542_v2 }
 0x282   : > { %2547 = vmatpush3.bf16.xpose.msk.msra.mxu1 %vm3428_vm1, %v2542_v2 }
 0x283   : > { %2549 = vmatprep.subr.bf16.mxu1 %v2548_v60 }
 0x285   : > { %967 = vrot.lane.b32.xlu1 %v3420_v51, %s3085_s17 }
 0x289   : > { %2771 = vrot.lane.b32.xlu1 %v3424_v61, %s3085_s17  ;;  %2290 = vmatmul.mubr.msk.f32.vlgmr.msra.gmra.mrb[4].mxu1 %vm773_vm0, %v3442_v3 }
 0x28a   : > { %2551 = vmatpush3.bf16.msra.mxu1 %v2548_v60 }
 0x2f3   : > { %v2767_v4 = vpop.permute.xlu1 %2766 }
 0x2f4   : > { %v2769_v5 = vunpack.i.h.bf16 %v2767_v4  ;;  %v2768_v6 = vunpack.i.l.bf16 %v2767_v4 }
 0x2f6   : > { %v2552_v7 = vpack.c.bf16 %v2769_v5, %v2768_v6 }
 0x2f7   : > { %v968_v19 = vpop.permute.xlu1 %967 }
 0x2f8   : > { %2554 = vmatprep.subr.msk.bf16.mxu1 %vm3428_vm1, %v2552_v7 }
 0x2fb   : > { %v2772_v21 = vpop.permute.xlu1 %2771 }
 0x2fc   : > { %v2774_v23 = vunpack.i.h.bf16 %v2772_v21  ;;  %v2773_v24 = vunpack.i.l.bf16 %v2772_v21 }
 0x2fe   : > { %v2558_v26 = vpack.c.bf16 %v2774_v23, %v2773_v24 }
 0x35c   : > { %v2291_v8 = vpop.f32.mrb[4].mxu1 }
 0x35d   : > { %v852_v9 = vpop.f32.mrb[5].mxu1  ;;  %v862_v11 = vmul.f32 0.17677669, %v2291_v8 }
 0x35e   : > { %v861_v10 = vmul.f32 0.17677669, %v852_v9 }
 0x35f   : > { %v867_v13 = vsel %vm863_vm2, %v862_v11, -inf }
 0x360   : > { %v864_v12 = vsel %vm863_vm2, %v861_v10, -inf }
 0x361   : > { %865 = vmax.xlane.f32.xlu0 %v864_v12 }
 0x365   : > { %868 = vmax.xlane.f32.xlu0 %v867_v13 }
 0x37b   : > { %969 = vrot.lane.b32.xlu0 %v3442_v3, %s3085_s17 }
 0x3ee   : > { %v866_v14 = vpop.xlane.xlu0 %865 }
 0x3ef   : > { %v870_v15 = vsub.f32 %v861_v10, %v866_v14 }
 0x3f1   : > { %v872_v16 = vmul.f32 1.442695, %v870_v15 }
 0x3f2   : > { %v869_v17 = vpop.xlane.xlu0 %868 }
 0x3f3   : > { %2810 = vpow2.f32 %v872_v16  ;;  %v871_v18 = vsub.f32 %v862_v11, %v869_v17 }
 0x3f5   : > { %v874_v20 = vmul.f32 1.442695, %v871_v18 }
 0x3f6   : > { %v970_v27 = vpop.permute.xlu0 %969 }
 0x3f7   : > { %2812 = vpow2.f32 %v874_v20 }
 0x3fd   : > { %v3454_v22 = vpop.eup %2810 }
 0x3fe   : > { %2296 = vmatprep.mubr.msk.f32.mxu1 %vm863_vm2, %v3454_v22 }
 0x401   : > { %v3458_v25 = vpop.eup %2812 }
 0x402   : > { %2297 = vmatmul.mubr.msk.f32.vlgmr.msra.gmra.mrb[6].mxu1 %vm863_vm2, %v3458_v25 }
 0x403   : > { %2557 = vmatpush3.bf16.xpose.msk.msra.mxu1 %vm3428_vm1, %v2552_v7  ;;  %2303 = vmatprep.mubr.msk.f32.mxu1 %vm773_vm0, %v968_v19 }
 0x404   : > { %2559 = vmatprep.subr.bf16.mxu1 %v2558_v26 }
 0x40a   : > { %2304 = vmatmul.mubr.msk.f32.vlgmr.msra.gmra.mrb[8].mxu1 %vm773_vm0, %v970_v27 }
 0x40b   : > { %2561 = vmatpush3.bf16.msra.mxu1 %v2558_v26 }
 0x4d5   : > { %v3466_v28 = vpop.f32.mrb[6].mxu1 }
 0x4d6   : > { %v3468_v29 = vpop.f32.mrb[7].mxu1 }
 0x4dd   : > { %v2305_v30 = vpop.f32.mrb[8].mxu1 }
 0x4de   : > { %v1059_v31 = vmul.f32 0.17677669, %v2305_v30  ;;  %v1049_v32 = vpop.f32.mrb[9].mxu1 }
 0x4df   : > { %v1058_v33 = vmul.f32 0.17677669, %v1049_v32 }
 0x4e0   : > { %v1063_v35 = vsel %vm863_vm2, %v1059_v31, -inf }
 0x4e1   : > { %1064 = vmax.xlane.f32.xlu0 %v1063_v35  ;;  %v1060_v36 = vsel %vm863_vm2, %v1058_v33, -inf }
 0x4e2   : > { %1061 = vmax.xlane.f32.xlu1 %v1060_v36 }
 0x4f3   : > { %1171 = vrot.lane.b32.xlu1 %v3420_v51, %s3086_s24 }
 0x4f7   : > { %2776 = vrot.lane.b32.xlu0 %v3432_v1, %s3086_s24  ;;  %1173 = vrot.lane.b32.xlu1 %v3442_v3, %s3086_s24 }
 0x4fb   : > { %2781 = vrot.lane.b32.xlu1 %v3424_v61, %s3086_s24 }
 0x56e   : > { %v1065_v37 = vpop.xlane.xlu0 %1064 }
 0x56f   : > { %v1067_v38 = vsub.f32 %v1059_v31, %v1065_v37  ;;  %v1062_v39 = vpop.xlane.xlu1 %1061 }
 0x570   : > { %v1066_v40 = vsub.f32 %v1058_v33, %v1062_v39 }
 0x571   : > { %v1070_v41 = vmul.f32 1.442695, %v1067_v38 }
 0x572   : > { %v1068_v42 = vmul.f32 1.442695, %v1066_v40  ;;  %v2777_v44 = vpop.permute.xlu0 %2776 }
 0x573   : > { %v2779_v45 = vunpack.i.h.bf16 %v2777_v44  ;;  %v2778_v46 = vunpack.i.l.bf16 %v2777_v44  ;;  %v1172_v47 = vpop.permute.xlu1 %1171 }
 0x574   : > { %2814 = vpow2.f32 %v1068_v42 }
 0x575   : > { %2816 = vpow2.f32 %v1070_v41  ;;  %v2562_v48 = vpack.c.bf16 %v2779_v45, %v2778_v46 }
 0x577   : > { %2564 = vmatprep.subr.msk.bf16.mxu1 %vm3428_vm1, %v2562_v48  ;;  %v1174_v49 = vpop.permute.xlu1 %1173 }
 0x57b   : > { %v2782_v50 = vpop.permute.xlu1 %2781 }
 0x57c   : > { %v2784_v52 = vunpack.i.h.bf16 %v2782_v50  ;;  %v2783_v53 = vunpack.i.l.bf16 %v2782_v50 }
 0x57e   : > { %v2815_v54 = vpop.eup %2814  ;;  %v2568_v55 = vpack.c.bf16 %v2784_v52, %v2783_v53 }
 0x57f   : > { %v2817_v56 = vpop.eup %2816  ;;  %2310 = vmatprep.mubr.msk.f32.mxu1 %vm863_vm2, %v2815_v54  ;;  %v1072_v0 = vsel %vm863_vm2, %v2815_v54, 0.0 }
 0x580   : > { %2311 = vmatmul.mubr.msk.f32.vlgmr.msra.gmra.mrb[10].mxu1 %vm863_vm2, %v2817_v56  ;;  %v1075_v26 = vsel %vm863_vm2, %v2817_v56, 0.0 }
 0x581   : > { %2567 = vmatpush3.bf16.xpose.msk.msra.mxu1 %vm3428_vm1, %v2562_v48  ;;  %2317 = vmatprep.mubr.msk.f32.mxu1 %vm773_vm0, %v1172_v47 }
 0x582   : > { %2569 = vmatprep.subr.bf16.mxu1 %v2568_v55 }
 0x588   : > { %2318 = vmatmul.mubr.msk.f32.vlgmr.msra.gmra.mrb[12].mxu1 %vm773_vm0, %v1174_v49 }
 0x589   : > { %2571 = vmatpush3.bf16.msra.mxu1 %v2568_v55  ;;  %v876_v55 = vsel %vm863_vm2, %v3454_v22, 0.0 }
 0x653   : > { %v3488_v57 = vpop.f32.mrb[10].mxu1 }
 0x654   : > { %v3490_v58 = vpop.f32.mrb[11].mxu1 }
 0x65b   : > { %v2319_v59 = vpop.f32.mrb[12].mxu1 }
 0x65c   : > { %v1263_v60 = vmul.f32 0.17677669, %v2319_v59  ;;  %v1253_v62 = vpop.f32.mrb[13].mxu1 }
 0x65d   : > { %v1262_v63 = vmul.f32 0.17677669, %v1253_v62 }
 0x65e   : > { %v1267_v2 = vsel %vm863_vm2, %v1263_v60, -inf }
 0x65f   : > { %1268 = vmax.xlane.f32.xlu0 %v1267_v2  ;;  %v1264_v4 = vsel %vm863_vm2, %v1262_v63, -inf }
 0x660   : > { %1265 = vmax.xlane.f32.xlu1 %v1264_v4 }
 0x671   : > { %1373 = vrot.lane.b32.xlu1 %v3420_v51, %s3087_s25 }
 0x675   : > { %2786 = vrot.lane.b32.xlu0 %v3432_v1, %s3087_s25  ;;  %1375 = vrot.lane.b32.xlu1 %v3442_v3, %s3087_s25 }
 0x6ec   : > { %v1269_v5 = vpop.xlane.xlu0 %1268 }
 0x6ed   : > { %v1271_v6 = vsub.f32 %v1263_v60, %v1269_v5  ;;  %v1266_v7 = vpop.xlane.xlu1 %1265  ;;  %v879_v60 = vsel %vm863_vm2, %v3458_v25, 0.0  ;;  %v1609_v5 = vld [vmem:[#allocation10 + $0x10] sm:$0xff]  ;;  %v1708_v25 = vadd.s32 8, %v3412_v43 }
 0x6ee   : > { %v1270_v8 = vsub.f32 %v1262_v63, %v1266_v7 }
 0x6ef   : > { %v1274_v9 = vmul.f32 1.442695, %v1271_v6  ;;  %v1610_v6 = vld [vmem:[#allocation10 + $0x18] sm:$0xff] }
 0x6f0   : > { %v1272_v10 = vmul.f32 1.442695, %v1270_v8  ;;  %v2787_v11 = vpop.permute.xlu0 %2786  ;;  %v2586_v7 = vpack.c.bf16 %v1610_v6, %v1609_v5  ;;  %v1611_v8 = vld [vmem:[#allocation10 + $0x20] sm:$0xff] }
 0x6f1   : > { %v2789_v12 = vunpack.i.h.bf16 %v2787_v11  ;;  %v2788_v13 = vunpack.i.l.bf16 %v2787_v11  ;;  %v1374_v3 = vpop.permute.xlu1 %1373  ;;  %v1709_v11 = vstv %s1705_s18  ;;  %s2091_s18 = sshll.u32 %s3185_s0, 4  ;;  %s3091_s0 = smov [#allocation13]  }
 0x6f2   : > { %2818 = vpow2.f32 %v1272_v10  ;;  %vm1710_vm4 = vcmp.lt.s32.totalorder %v3412_v43, %v1709_v11  ;;  %vm1711_vm5 = vcmp.lt.s32.totalorder %v1708_v25, %v1709_v11  ;;  %v1745_v11 = vld [vmem:[#allocation12 + $0x8] sm:$0xff]  ;;  %s3583_s12 = scalar_lea.hbm %s3672_s22, %s2091_s18  ;;  %s3000_s20 = sshll.u32 %s3091_s0, 4  ;;  %s3001_s20 = int_to_ptr.vmem [resolvable:$false] %s3000_s20 }
 0x6f3   : > { %2820 = vpow2.f32 %v1274_v9  ;;  %v2572_v14 = vpack.c.bf16 %v2789_v12, %v2788_v13  ;;  %v1612_v9 = vld [vmem:[#allocation10 + $0x28] sm:$0xff]  ;;  %v1613_v12 = vld [vmem:[#allocation10 + $0x30] sm:$0xff]  ;;  %v1614_v13 = vld [vmem:[#allocation10 + $0x38] sm:$0xff] }
 0x6f4   : > { %v2590_v10 = vpack.c.bf16 %v1612_v9, %v1611_v8 }
 0x6f5   : > { %2574 = vmatprep.subr.msk.bf16.mxu1 %vm3428_vm1, %v2572_v14  ;;  %v1376_v15 = vpop.permute.xlu1 %1375 }
 0x6fc   : > { %v2819_v51 = vpop.eup %2818 }
 0x6fd   : > { %v2821_v1 = vpop.eup %2820  ;;  %2324 = vmatprep.mubr.msk.f32.mxu1 %vm863_vm2, %v2819_v51  ;;  %v1276_v27 = vsel %vm863_vm2, %v2819_v51, 0.0  ;;  %v3535_v51 = vsel %vm1711_vm5, 1.0, %v3084_v34 }
 0x6fe   : > { %2325 = vmatmul.mubr.msk.f32.vlgmr.msra.gmra.mrb[14].mxu1 %vm863_vm2, %v2821_v1  ;;  %v1279_v30 = vsel %vm863_vm2, %v2821_v1, 0.0 }
 0x6ff   : > { %2577 = vmatpush3.bf16.xpose.msk.msra.mxu1 %vm3428_vm1, %v2572_v14  ;;  %2331 = vmatprep.mubr.msk.f32.mxu1 %vm773_vm0, %v1374_v3  ;;  %v3532_v14 = vsel %vm1710_vm4, 1.0, %v3084_v34  ;;  %v1718_v3 = vsel %vm1716_vm3, %v3535_v51, 0.0 }
 0x700   : > { %v1717_v1 = vsel %vm1716_vm3, %v3532_v14, 0.0 }
 0x706   : > { %2332 = vmatmul.mubr.msk.f32.vlgmr.msra.gmra.mrb[16].mxu1 %vm773_vm0, %v1376_v15  ;;  %v2594_v15 = vpack.c.bf16 %v1614_v13, %v1613_v12 }
 0x7d1   : > { %v2326_v16 = vpop.f32.mrb[14].mxu1 }
 0x7d2   : > { %v1360_v17 = vpop.f32.mrb[15].mxu1 }
 0x7d9   : > { %v2333_v18 = vpop.f32.mrb[16].mxu1 }
 0x7da   : > { %v1465_v19 = vmul.f32 0.17677669, %v2333_v18  ;;  %v1455_v20 = vpop.f32.mrb[17].mxu1  ;;  %v1616_v18 = vld [vmem:[#allocation10 + $0x48] sm:$0xff] }
 0x7db   : > { %v1464_v21 = vmul.f32 0.17677669, %v1455_v20  ;;  %v1618_v20 = vld [vmem:[#allocation10 + $0x58] sm:$0xff] }
 0x7dc   : > { %v1469_v23 = vsel %vm863_vm2, %v1465_v19, -inf }
 0x7dd   : > { %1470 = vmax.xlane.f32.xlu0 %v1469_v23  ;;  %v1466_v24 = vsel %vm863_vm2, %v1464_v21, -inf  ;;  %v1619_v23 = vld [vmem:[#allocation10 + $0x60] sm:$0xff] }
 0x7de   : > { %1467 = vmax.xlane.f32.xlu1 %v1466_v24  ;;  %v1620_v24 = vld [vmem:[#allocation10 + $0x68] sm:$0xff] }
 0x7e1   : > { %1073 = vadd.xlane.f32.xlu0 %v1072_v0  ;;  %v2606_v0 = vpack.c.bf16 %v1620_v24, %v1619_v23  ;;  %v1748_v23 = vld [vmem:[#allocation12 + $0x20] sm:$0xff]  ;;  %v1749_v24 = vld [vmem:[#allocation12 + $0x28] sm:$0xff] }
 0x7e5   : > { %1076 = vadd.xlane.f32.xlu0 %v1075_v26 }
 0x7e9   : > { %1277 = vadd.xlane.f32.xlu0 %v1276_v27 }
 0x7ed   : > { %1280 = vadd.xlane.f32.xlu0 %v1279_v30 }
 0x7ef   : > { %2791 = vrot.lane.b32.xlu1 %v3424_v61, %s3087_s25 }
 0x86a   : > { %v1471_v31 = vpop.xlane.xlu0 %1470 }
 0x86b   : > { %v1473_v32 = vsub.f32 %v1465_v19, %v1471_v31  ;;  %v1468_v33 = vpop.xlane.xlu1 %1467  ;;  %v1617_v19 = vld [vmem:[#allocation10 + $0x50] sm:$0xff] }
 0x86c   : > { %v1472_v35 = vsub.f32 %v1464_v21, %v1468_v33  ;;  %v2602_v21 = vpack.c.bf16 %v1618_v20, %v1617_v19  ;;  %v1746_v19 = vld [vmem:[#allocation12 + $0x10] sm:$0xff]  ;;  %v1747_v20 = vld [vmem:[#allocation12 + $0x18] sm:$0xff] }
 0x86d   : > { %v1476_v36 = vmul.f32 1.442695, %v1473_v32 }
 0x86e   : > { %v1474_v37 = vmul.f32 1.442695, %v1472_v35  ;;  %v1074_v38 = vpop.xlane.xlu0 %1073 }
 0x86f   : > { %2822 = vpow2.f32 %v1476_v36  ;;  %v2792_v39 = vpop.permute.xlu1 %2791 }
 0x870   : > { %2824 = vpow2.f32 %v1474_v37  ;;  %v2794_v40 = vunpack.i.h.bf16 %v2792_v39  ;;  %v2793_v41 = vunpack.i.l.bf16 %v2792_v39 }
 0x871   : > { %2826 = vrcp.f32 %v1074_v38 }
 0x872   : > { %v2578_v42 = vpack.c.bf16 %v2794_v40, %v2793_v41  ;;  %v1077_v44 = vpop.xlane.xlu0 %1076 }
 0x873   : > { %2828 = vrcp.f32 %v1077_v44  ;;  %v1622_v44 = vld [vmem:[#allocation10 + $0x78] sm:$0xff] }
 0x874   : > { %2579 = vmatprep.subr.bf16.mxu1 %v2578_v42 }
 0x875   : > { %2581 = vmatpush3.bf16.msra.mxu1 %v2578_v42  ;;  %v1621_v42 = vld [vmem:[#allocation10 + $0x70] sm:$0xff] }
 0x876   : > { %v1278_v45 = vpop.xlane.xlu0 %1277 }
 0x877   : > { %2830 = vrcp.f32 %v1278_v45  ;;  %v2610_v45 = vpack.c.bf16 %v1622_v44, %v1621_v42  ;;  %v1771_v42 = vld [vmem:[#allocation12 + $0xd8] sm:$0xff] }
 0x879   : > { %v2823_v61 = vpop.eup %2822 }
 0x87a   : > { %v2825_v46 = vpop.eup %2824  ;;  %v1281_v47 = vpop.xlane.xlu0 %1280  ;;  %v1481_v48 = vsel %vm863_vm2, %v2823_v61, 0.0 }
 0x87b   : > { %v2827_v49 = vpop.eup %2826  ;;  %2832 = vrcp.f32 %v1281_v47  ;;  %1482 = vadd.xlane.f32.xlu1 %v1481_v48  ;;  %2338 = vmatprep.mubr.msk.f32.mxu1 %vm863_vm2, %v2825_v46  ;;  %v1478_v50 = vsel %vm863_vm2, %v2825_v46, 0.0  ;;  %v1761_v46 = vld [vmem:[#allocation12 + $0x88] sm:$0xff]  ;;  %v1763_v48 = vld [vmem:[#allocation12 + $0x98] sm:$0xff] }
 0x87c   : > { %1479 = vadd.xlane.f32.xlu0 %v1478_v50  ;;  %2339 = vmatmul.mubr.msk.f32.vlgmr.msra.gmra.mrb[18].mxu1 %vm863_vm2, %v2823_v61  ;;  %v1169_v53 = vmul.f32 %v2827_v49, %v3490_v58  ;;  %v1608_v58 = vld [vmem:[#allocation10 + $0x8] sm:$0xff]  ;;  %v1760_v61 = vld [vmem:[#allocation12 + $0x80] sm:$0xff] }
 0x87d   : > { %v2829_v52 = vpop.eup %2828  ;;  %v2615_v47 = vpack.c.bf16 %v1761_v46, %v1760_v61  ;;  %v1755_v61 = vld [vmem:[#allocation12 + $0x58] sm:$0xff]  ;;  %2408 = vmatprep.mubr.msk.f32.mxu1 %vm3090_vm8, %v3084_v34 }
 0x87e   : > { %v1170_v54 = vmul.f32 %v2829_v52, %v3488_v57  ;;  %v1607_v57 = vld [vmem:[#allocation10] sm:$0xff] }
 0x87f   : > { %v2582_v22 = vpack.c.bf16 %v1608_v58, %v1607_v57 }
 0x880   : > { %877 = vadd.xlane.f32.xlu0 %v876_v55  ;;  %v2795_v56 = vpack.i.bf16 %v1170_v54, %v1169_v53 }
 0x881   : > { %v2831_v59 = vpop.eup %2830  ;;  %2583 = vmatprep.subr.bf16.mxu0 %v2582_v22 }
 0x882   : > { %v1371_v63 = vmul.f32 %v2831_v59, %v1360_v17  ;;  %2585 = vmatpush3.bf16.msra.mxu0 %v2582_v22  ;;  %v1615_v17 = vld [vmem:[#allocation10 + $0x40] sm:$0xff] }
 0x883   : > { %2587 = vmatprep.subr.bf16.mxu0 %v2586_v7  ;;  %v2598_v43 = vpack.c.bf16 %v1616_v18, %v1615_v17  ;;  %v1764_v59 = vld [vmem:[#allocation12 + $0xa0] sm:$0xff] }
 0x884   : > { %880 = vadd.xlane.f32.xlu0 %v879_v60  ;;  %v1765_v60 = vld [vmem:[#allocation12 + $0xa8] sm:$0xff] }
 0x885   : > { %v2833_v62 = vpop.eup %2832 }
 0x886   : > { %v1372_v2 = vmul.f32 %v2833_v62, %v2326_v16  ;;  %2589 = vmatpush3.bf16.msra.mxu0 %v2586_v7  ;;  %v1719_v16 = vadd.f32 %v1718_v3, %v1717_v1 }
 0x887   : > { %2591 = vmatprep.subr.bf16.mxu0 %v2590_v10 }
 0x888   : > { %v2800_v4 = vpack.i.bf16 %v1372_v2, %v1371_v63  ;;  %v2621_v63 = vpack.c.bf16 %v1765_v60, %v1764_v59  ;;  %v1759_v59 = vld [vmem:[#allocation12 + $0x78] sm:$0xff] }
 0x88a   : > { %2593 = vmatpush3.bf16.msra.mxu0 %v2590_v10  ;;  %v1744_v10 = vld [vmem:[#allocation12] sm:$0xff] }
 0x88b   : > { %2595 = vmatprep.subr.bf16.mxu0 %v2594_v15  ;;  %v2639_v17 = vpack.c.bf16 %v1745_v11, %v1744_v10 }
 0x88e   : > { %2597 = vmatpush3.bf16.msra.mxu0 %v2594_v15 }
 0x88f   : > { %2599 = vmatprep.subr.bf16.mxu0 %v2598_v43 }
 0x892   : > { %2601 = vmatpush3.bf16.msra.mxu0 %v2598_v43 }
 0x893   : > { %2603 = vmatprep.subr.bf16.mxu0 %v2602_v21 }
 0x896   : > { %2605 = vmatpush3.bf16.msra.mxu0 %v2602_v21  ;;  %v2642_v21 = vpack.c.bf16 %v1747_v20, %v1746_v19 }
 0x897   : > { %2607 = vmatprep.subr.bf16.mxu0 %v2606_v0 }
 0x89a   : > { %2796 = vrot.lane.b32.xlu0 %v2795_v56, %s3087_s25  ;;  %2609 = vmatpush3.bf16.msra.mxu0 %v2606_v0  ;;  %v2645_v0 = vpack.c.bf16 %v1749_v24, %v1748_v23  ;;  %s3671_s25 = sld [smem:[#allocation21_spill]] }
 0x89b   : > { %2611 = vmatprep.subr.bf16.mxu0 %v2610_v45 }
 0x89e   : > { %2801 = vrot.lane.b32.xlu0 %v2800_v4, %s3086_s24  ;;  %2613 = vmatpush3.bf16.msra.mxu0 %v2610_v45  ;;  %v1754_v45 = vld [vmem:[#allocation12 + $0x50] sm:$0xff] }
 0x89f   : > { %v2654_v46 = vpack.c.bf16 %v1755_v61, %v1754_v45 }
 0x8bd   : > { %1720 = vadd.xlane.f32.xlu0 %v1719_v16 }
 0x908   : > { %v1483_v41 = vpop.xlane.xlu1 %1482 }
 0x909   : > { %v1480_v26 = vpop.xlane.xlu0 %1479 }
 0x90d   : > { %v878_v27 = vpop.xlane.xlu0 %877 }
 0x90e   : > { %2834 = vrcp.f32 %v878_v27  ;;  %v1767_v27 = vld [vmem:[#allocation12 + $0xb8] sm:$0xff] }
 0x911   : > { %v881_v30 = vpop.xlane.xlu0 %880 }
 0x912   : > { %2836 = vrcp.f32 %v881_v30 }
 0x913   : > { %2838 = vrcp.f32 %v1483_v41  ;;  %v1770_v41 = vld [vmem:[#allocation12 + $0xd0] sm:$0xff] }
 0x914   : > { %2840 = vrcp.f32 %v1480_v26  ;;  %v1766_v26 = vld [vmem:[#allocation12 + $0xb0] sm:$0xff]  ;;  %v2630_v44 = vpack.c.bf16 %v1771_v42, %v1770_v41 }
 0x915   : > { %v2797_v31 = vpop.permute.xlu0 %2796  ;;  %v2624_v30 = vpack.c.bf16 %v1767_v27, %v1766_v26 }
 0x916   : > { %v2798_v33 = vunpack.i.l.bf16 %v2797_v31  ;;  %v2799_v39 = vunpack.i.h.bf16 %v2797_v31  ;;  %v1750_v31 = vld [vmem:[#allocation12 + $0x30] sm:$0xff] }
 0x918   : > { %v2835_v32 = vpop.eup %2834 }
 0x919   : > { %v965_v35 = vmul.f32 %v2835_v32, %v3468_v29  ;;  %v3088_v29 = vmov 0.0|0.0   ;;  %v2802_v2 = vpop.permute.xlu0 %2801  ;;  %v1751_v32 = vld [vmem:[#allocation12 + $0x38] sm:$0xff] }
 0x91a   : > { %2614 = vmatprep.subr.bf16.mxu1 %v3088_v29  ;;  %2638 = vmatprep.subr.bf16.mxu0 %v3088_v29  ;;  %v2803_v25 = vunpack.i.l.bf16 %v2802_v2  ;;  %v2804_v12 = vunpack.i.h.bf16 %v2802_v2 }
 0x91b   : > { %v3541_v36 = vsel %vm773_vm0, %v965_v35, %v2798_v33  ;;  %2616 = vmatpush3.bf16.msra.mxu1 %v2615_v47  ;;  %v2648_v33 = vpack.c.bf16 %v1751_v32, %v1750_v31  ;;  %v1768_v35 = vld [vmem:[#allocation12 + $0xc0] sm:$0xff] }
 0x91c   : > { %v2837_v37 = vpop.eup %2836  ;;  %2617 = vmatprep.subr.bf16.mxu1 %v3088_v29  ;;  %v1602_v15 = vsel %vm1601_vm6, %v3541_v36, %v2803_v25  ;;  %v1769_v36 = vld [vmem:[#allocation12 + $0xc8] sm:$0xff]  ;;  %v1772_v47 = vld [vmem:[#allocation12 + $0xe0] sm:$0xff] }
 0x91d   : > { %v966_v38 = vmul.f32 %v2837_v37, %v3466_v28  ;;  %v1762_v28 = vld [vmem:[#allocation12 + $0x90] sm:$0xff]  ;;  %v2839_v49 = vpop.eup %2838  ;;  %v2627_v37 = vpack.c.bf16 %v1769_v36, %v1768_v35 }
 0x91e   : > { %v2618_v52 = vpack.c.bf16 %v1763_v48, %v1762_v28  ;;  %v2841_v53 = vpop.eup %2840  ;;  %v1773_v28 = vld [vmem:[#allocation12 + $0xe8] sm:$0xff] }
 0x91f   : > { %v1600_v40 = vsel %vm773_vm0, %v966_v38, %v2799_v39  ;;  %v1752_v38 = vld [vmem:[#allocation12 + $0x40] sm:$0xff]  ;;  %v1753_v39 = vld [vmem:[#allocation12 + $0x48] sm:$0xff]  ;;  %v2633_v48 = vpack.c.bf16 %v1773_v28, %v1772_v47 }
 0x920   : > { %2619 = vmatpush3.bf16.msra.mxu1 %v2618_v52  ;;  %v1603_v16 = vsel %vm1601_vm6, %v1600_v40, %v2804_v12  ;;  %v2651_v40 = vpack.c.bf16 %v1753_v39, %v1752_v38 }
 0x921   : > { %2620 = vmatprep.subr.bf16.mxu1 %v3088_v29 }
 0x924   : > { %2622 = vmatpush3.bf16.msra.mxu1 %v2621_v63 }
 0x925   : > { %2623 = vmatprep.subr.bf16.mxu1 %v3088_v29 }
 0x928   : > { %2625 = vmatpush3.bf16.msra.mxu1 %v2624_v30 }
 0x929   : > { %2626 = vmatprep.subr.bf16.mxu1 %v3088_v29 }
 0x92c   : > { %2628 = vmatpush3.bf16.msra.mxu1 %v2627_v37 }
 0x92d   : > { %2629 = vmatprep.subr.bf16.mxu1 %v3088_v29 }
 0x930   : > { %2631 = vmatpush3.bf16.msra.mxu1 %v2630_v44 }
 0x931   : > { %2632 = vmatprep.subr.bf16.mxu1 %v3088_v29 }
 0x934   : > { %2634 = vmatpush3.bf16.msra.mxu1 %v2633_v48 }
 0x935   : > { %2635 = vmatprep.subr.bf16.mxu1 %v3088_v29 }
 0x94a   : > { %v1721_v4 = vpop.xlane.xlu0 %1720 }
 0x94b   : > { %v1722_v57 = vrot.slane %v1721_v4, 4 }
 0x94d   : > { %v1723_v58 = vadd.f32 %v1722_v57, %v1721_v4 }
 0x94f   : > { %v2340_v50 = vpop.f32.mrb[18].mxu1  ;;  %v1724_v5 = vrot.slane %v1723_v58, 2 }
 0x950   : > { %v1574_v54 = vmul.f32 %v2839_v49, %v2340_v50  ;;  %v1562_v55 = vpop.f32.mrb[19].mxu1  ;;  %v1756_v49 = vld [vmem:[#allocation12 + $0x60] sm:$0xff]  ;;  %v1757_v50 = vld [vmem:[#allocation12 + $0x68] sm:$0xff] }
 0x951   : > { %v1573_v56 = vmul.f32 %v2841_v53, %v1562_v55  ;;  %v1725_v22 = vadd.f32 %v1724_v5, %v1723_v58  ;;  %v2657_v52 = vpack.c.bf16 %v1757_v50, %v1756_v49  ;;  %v1774_v53 = vld [vmem:[#allocation12 + $0xf0] sm:$0xff] }
 0x953   : > { %v2805_v62 = vpack.i.bf16 %v1574_v54, %v1573_v56  ;;  %v1726_v6 = vrot.slane %v1725_v22, 1  ;;  %v1775_v54 = vld [vmem:[#allocation12 + $0xf8] sm:$0xff]  ;;  %v1758_v56 = vld [vmem:[#allocation12 + $0x70] sm:$0xff] }
 0x954   : > { %v2636_v55 = vpack.c.bf16 %v1775_v54, %v1774_v53  ;;  %v2660_v60 = vpack.c.bf16 %v1759_v59, %v1758_v56 }
 0x955   : > { %2806 = vrot.lane.b32.xlu1 %v2805_v62, %s3085_s17  ;;  %v1727_v7 = vadd.f32 %v1726_v6, %v1725_v22  ;;  %v1776_v62 = vld [vmem:[%s453_s13] sm:$0x1]  ;;  %s1922_s13 = scalar_lea.sflag [#allocation6], %s3387_s11 }
 0x956   : > { %2637 = vmatpush3.bf16.msra.mxu1 %v2636_v55 }
 0x957   : > { %2662 = vpush %v1727_v7 }
 0x959   : > { %2409 = vmatmul.mubr.f32.vlgmr.msra.gmra.mrb[20].mxu1 %v1776_v62 }
 0x988   : > { %s2663_s19 = spop %2662 }
 0x989   : > { %s1729_s23 = smax.f32 %s3089_s26, %s2663_s19  ;;  %s450_s19 = scalar_lea.vmem [#allocation13], %s3387_s11 }
 0x98a   : > { %v1739_v8 = vstv %s1729_s23  ;;  %s1934_s26 = sshll.u32 %s450_s19, 4  ;;  %s3585_s26 = int_to_ptr.vmem [resolvable:$true] %s1934_s26 }
 0x98b   : > { %2842 = vrcp.f32 %v1739_v8  ;;  %s2996_s15 = scalar_lea.vmem %s3585_s26, 16  ;;  %p3003_p4 = scmp.lt.s32.totalorder %s3585_s26, %s3001_s20 }
 0x98c   : > { %p2997_p8 = scmp.ne.s32.totalorder %s3585_s26, %s2996_s15 }
 0x98e   : > { %p2998_p10 = pnand %p2997_p8, %p3332_p13 }
 0x990   : > { %p2999_p1 = pneg %p2998_p10 }
 0x995   : > { %v2843_v9 = vpop.eup %2842 }
 0x996   : > { %2664 = vpush %v2843_v9 }
 0x9c7   : > { %v2807_v13 = vpop.permute.xlu1 %2806  ;;  %s2665_s10 = spop %2664 }
 0x9c8   : > { %v2809_v1 = vunpack.i.h.bf16 %v2807_v13  ;;  %v2808_v3 = vunpack.i.l.bf16 %v2807_v13  ;;  %v1742_v10 = vstv %s2665_s10  ;;  %s3002_s10 = scalar_lea.vmem %s3001_s20, 32 }
 0x9c9   : > { %p3004_p5 = scmp.lt.s32.totalorder %s3002_s10, %s2996_s15 }
 0x9ca   : > { %v1605_v18 = vsel %vm1604_vm7, %v1602_v15, %v2808_v3  ;;  %v1606_v43 = vsel %vm1604_vm7, %v1603_v16, %v2809_v1 }
 0x9cb   : > { %2373 = vmatprep.mubr.f32.mxu0 %v1605_v18  ;;  %p3005_p2 = por %p3004_p5, %p3003_p4 }
 0x9cc   : > { %2374 = vmatmul.mubr.f32.vlgmr.msra.gmra.mrb[4].mxu0 %v1606_v43 }
 0x9cd   : > { %2640 = vmatpush3.bf16.msra.mxu0 %v2639_v17  ;;  %2443 = vmatprep.mubr.msk.f32.mxu0 %vm3090_vm8, %v3084_v34  ;;  %p3006_p12 = pnand %p3005_p2, %p2999_p1 }
 0x9ce   : > { %2641 = vmatprep.subr.bf16.mxu0 %v3088_v29 }
 0x9d1   : > { %2643 = vmatpush3.bf16.msra.mxu0 %v2642_v21 }
 0x9d2   : > { %2644 = vmatprep.subr.bf16.mxu0 %v3088_v29 }
 0x9d5   : > { %2646 = vmatpush3.bf16.msra.mxu0 %v2645_v0 }
 0x9d6   : > { %2647 = vmatprep.subr.bf16.mxu0 %v3088_v29 }
 0x9d9   : > { %2649 = vmatpush3.bf16.msra.mxu0 %v2648_v33 }
 0x9da   : > { %2650 = vmatprep.subr.bf16.mxu0 %v3088_v29 }
 0x9dd   : > { %2652 = vmatpush3.bf16.msra.mxu0 %v2651_v40 }
 0x9de   : > { %2653 = vmatprep.subr.bf16.mxu0 %v3088_v29 }
 0x9e1   : > { %2655 = vmatpush3.bf16.msra.mxu0 %v2654_v46 }
 0x9e2   : > { %2656 = vmatprep.subr.bf16.mxu0 %v3088_v29 }
 0x9e5   : > { %2658 = vmatpush3.bf16.msra.mxu0 %v2657_v52 }
 0x9e6   : > { %2659 = vmatprep.subr.bf16.mxu0 %v3088_v29  ;;  %v2088_v29 = vld [vmem:[%s3635_s8] ss:$0 sm:$0xff] }
 0x9e9   : > { %2661 = vmatpush3.bf16.msra.mxu0 %v2660_v60 }
 0xa2c   : > { %v1843_v12 = vpop.f32.mrb[20].mxu1 }
 0xa2d   : > { %v2410_v13 = vpop.f32.mrb[21].mxu1 }
 0xa9f   : > { %v2375_v63 = vpop.f32.mrb[4].mxu0 }
 0xaa0   : > { %v1702_v2 = vadd.f32 %v2375_v63, %v2088_v29  ;;  %v1696_v4 = vpop.f32.mrb[5].mxu0 }
 0xaa1   : > { %v1697_v57 = vadd.f32 %v2088_v29, %v1696_v4 }
 0xaa2   : > { %v1731_v58 = vmul.f32 %v3535_v51, %v1702_v2 }
 0xaa3   : > { %v1730_v5 = vmul.f32 %v3532_v14, %v1697_v57  ;;  %v1917_v14 = vld [vmem:[%s3671_s25] sm:$0x1] }
 0xaa5   : > { %v1732_v22 = vadd.f32 %v1731_v58, %v1730_v5 }
 0xaa7   : > { %v1733_v6 = vrot.slane %v1732_v22, 4 }
 0xaa9   : > { %v1734_v7 = vadd.f32 %v1733_v6, %v1732_v22 }
 0xaab   : > { %v1735_v34 = vrot.slane %v1734_v7, 2 }
 0xaad   : > { %v1736_v8 = vadd.f32 %v1735_v34, %v1734_v7 }
 0xaaf   : > { %v1737_v9 = vrot.slane %v1736_v8, 1 }
 0xab1   : > { %v1738_v25 = vadd.f32 %v1737_v9, %v1736_v8 }
 0xab3   : > { %v1743_v11 = vmul.f32 %v1742_v10, %v1738_v25 }
 0xab5   : > { %2444 = vmatmul.mubr.f32.vlgmr.msra.gmra.mrb[6].mxu0 %v1743_v11 }
 0xb88   : > { %v1913_v51 = vpop.f32.mrb[6].mxu0 }
 0xb89   : > { %v1914_v1 = vadd.f32 %v1913_v51, %v1843_v12  ;;  %v2445_v3 = vpop.f32.mrb[7].mxu0 }
 0xb8b   : > { %v1918_v15 = vadd.f32 %v1917_v14, %v1914_v1 }
 0xb8d   : > { %v1919_v16 = vmax.f32 %v1918_v15, 0.0 }
 0xb8f   : > { %1920 = vst [vmem:[%s450_s19] sm:$0x1] %v1919_v16 }
 0xb90   : > { %3009 = shalt.err (!%p3006_p12)
}
 0xb91   : > { %s3010_s11 = scalar_lea.hbm %s3583_s12, 16  ;;  %s3014_s25 = scalar_lea.hbm %s3672_s22, 32 }
 0xb92   : > { %p3011_p3 = scmp.ne.s32.totalorder %s3583_s12, %s3010_s11  ;;  %p3015_p11 = scmp.lt.u32.totalorder %s3583_s12, %s3672_s22 }
 0xb93   : > { %p3016_p9 = scmp.lt.u32.totalorder %s3014_s25, %s3010_s11  ;;  %p3018_p8 = scmp.lt.u32.totalorder %s3010_s11, %s3583_s12 }
 0xb94   : > { %p3012_p0 = pnand %p3011_p3, %p3332_p13 }
 0xb95   : > { %p3017_p6 = por %p3016_p9, %p3015_p11 }
 0xb96   : > { %p3013_p7 = pneg %p3012_p0 }
 0xb97   : > { %p3019_p10 = por %p3018_p8, %p3017_p6 }
 0xb99   : > { %p3020_p1 = pnand %p3019_p10, %p3013_p7 }
 0xb9b   : > { %3023 = shalt.err (!%p3020_p1)
}
 0xb9c   : > { %2684 = dma.vmem_to_hbm [thread:$0]  (%p3332_p13), %s3585_s26, 16, %s3583_s12, %s1922_s13  }
 0xb9d PF: > { %s3673_s23 = sld [smem:[#allocation19_spill]]  ;;  %s3674_s21 = sld [smem:[#allocation20_spill]] }
 0xb9e   : > { %p3676_p5 = scmp.ge.s32.totalorder %s3072_s30, 2 }
 0xba3   : > { %s1946_s15 = sand.u32 1, %s3673_s23   ;;  %p3675_p4 = scmp.ne.s32.totalorder %s3674_s21, 0 }
 0xba4   : > { %s1947_s0 = scalar_lea.sflag [#allocation6], %s1946_s15 }
 0xba5   : > { %p2704_p2 = pnand %p3676_p5, %p3675_p4 }
 0xba7   : > { %3055 = dma.done.wait (!%p2704_p2), %s1947_s0, 16  }
 0xba8   : > { %3057 = vsyncadd (!%p2704_p2), %s1947_s0, 4294967280  ;;  %p30_p12 = scmp.ge.s32.totalorder %s3322_s16, 4   ;;  %s3677_s27 = smov %s3064_s28 }
 0xba9   : > { %s3678_s28 = smov %s3068_s29  ;;  %s3679_s29 = smov %s3338_s14 }
 0xbaa   : > { %s3680_s30 = smov %s3322_s16  ;;  %32 = sbr.rel (!%p30_p12) target bundleno = 20 (0x14), region = 124 }
 0xbb1   :  { %1951 = vsyncpa [#allocation5], 1 }
 0xbb2   :  { %1953 = vsyncpa [#allocation5 + $0x1], 1 }
 0xbb3   :  { %1954 = vsyncpa [#allocation8], 1 }
 0xbb4   :  { %1955 = vsyncpa [#allocation11], 1 }
 0xbb5   :  { %1956 = vsyncpa [#allocation6], 1 }
 0xbb6   :  { %1958 = vsyncpa [#allocation6 + $0x1], 1 }

</bundles_post_ra>
